<compile_context>
chip_gen: v7x
topology: tpu7x:2x2x1
jax: 0.10.0
libtpu: 0.0.40
codegen_flags: <defaults>
</compile_context>

<pallas_src>
import functools

import jax
import jax.numpy as jnp
from jax.experimental import pallas as pl
from jax.experimental.pallas import tpu as pltpu

PAD = 6  # halo radius required by the 13x13 max pool


def _round_up(x, m):
    return ((x + m - 1) // m) * m


def _cdiv(a, b):
    return -(-a // b)


# ----------------------------------------------------------------------------
# Fused SPPBottleneck kernel (one image per grid step)
# ----------------------------------------------------------------------------
def _spp_kernel(x_ref, mask_ref, w1t_ref, b1_ref, w2t_ref, b2_ref, o_ref,
                cat_ref, *, Wp):
    # x_ref    : (1, Cin, Lp)   zero-padded input image, Lp = Hp*Wp
    # mask_ref : (1, Lp)        additive 0 / -inf border mask (padded grid)
    # w1t_ref  : (C, Cin)       conv1 1x1 weight, BN folded (eval mode)
    # b1_ref   : (C, 1)         conv1 folded bias
    # w2t_ref  : (Cout, 4C)     conv2 1x1 weight, BN folded; cols = [x1|p5|p9|p13]
    # b2_ref   : (Cout, 1)      conv2 folded bias
    # o_ref    : (1, Cout, LG)  output, LG = H*Wp (junk pad columns cropped outside)
    # cat_ref  : (4C, LG)       VMEM scratch holding the channel concat
    C = w1t_ref.shape[0]
    LG = o_ref.shape[-1]

    # ---- conv1: 1x1 conv + folded BN + SiLU (one MXU dot, lane-dense) -------
    a = jnp.dot(w1t_ref[...], x_ref[0],
                preferred_element_type=jnp.float32) + b1_ref[...]
    # Additive -inf outside the real image reproduces MaxPool2d's -inf padding.
    x1 = a * jax.nn.sigmoid(a) + mask_ref[...]            # (C, Lp)

    # ---- chained separable *valid* 5x5 max pools on the flattened grid ------
    # pool5(v)[:, r*Wp + c] = max(v[:, (r+dy)*Wp + (c+dx)]) for dx,dy in 0..4
    # (anchored at the window's top-left corner).  The -inf halo keeps any
    # row-crossing garbage away from every lane that is eventually read.
    def pool5(v):
        n = v.shape[-1] - 4
        m = v[:, :n]
        for dx in range(1, 5):                            # W direction (lanes)
            m = jnp.maximum(m, v[:, dx:dx + n])
        n2 = n - 4 * Wp
        o = m[:, :n2]
        for dy in range(1, 5):                            # H direction (row stride)
            o = jnp.maximum(o, m[:, dy * Wp:dy * Wp + n2])
        return o

    a5 = pool5(x1)     # 5x5  max (top-left anchored)
    a9 = pool5(a5)     # 9x9  max
    a13 = pool5(a9)    # 13x13 max

    # ---- build the concat [x1 | p5 | p9 | p13] in one VMEM scratch ----------
    # Output pixel (y, x) lives at lane g = y*Wp + x; each branch is a single
    # contiguous lane slice (window-center -> top-left offset per branch).
    cat_ref[0 * C:1 * C, :] = x1[:, PAD * Wp + PAD: PAD * Wp + PAD + LG]
    cat_ref[1 * C:2 * C, :] = a5[:, 4 * Wp + 4: 4 * Wp + 4 + LG]
    cat_ref[2 * C:3 * C, :] = a9[:, 2 * Wp + 2: 2 * Wp + 2 + LG]
    cat_ref[3 * C:4 * C, :] = a13[:, :LG]

    # ---- conv2: a single K=4C MXU dot + folded BN + SiLU --------------------
    o = jnp.dot(w2t_ref[...], cat_ref[...],
                preferred_element_type=jnp.float32) + b2_ref[...]
    o_ref[0] = o * jax.nn.sigmoid(o)                      # (Cout, LG) dense store


def spp_bottleneck_forward(x_nchw, params):
    B, Cin, H, W = x_nchw.shape
    C = params['w1t'].shape[0]
    Cout = params['w2t'].shape[0]

    # Padded grid: left/top pad = 6; right/bottom pads >= 6, lane-rounded so
    # LG = H*Wp is vreg-friendly (W=16 -> Wp=32, LG=512 = 4 full lane tiles).
    Wp = _round_up(W + 2 * PAD, 8)
    Hp = H + 2 * PAD + _cdiv(12, Wp)     # enough rows for 3 chained valid 5-pools
    Lp = Hp * Wp
    LG = H * Wp

    # Zero-pad spatially and flatten (cheap XLA-side plumbing on contiguous
    # NCHW); padded values are forced to -inf right after conv1 by `mask`.
    xp = jnp.pad(x_nchw, ((0, 0), (0, 0),
                          (PAD, Hp - H - PAD), (PAD, Wp - W - PAD)))
    xp = xp.reshape(B, Cin, Lp)

    row = jnp.arange(Hp, dtype=jnp.int32)[:, None]
    col = jnp.arange(Wp, dtype=jnp.int32)[None, :]
    interior = ((row >= PAD) & (row < PAD + H) &
                (col >= PAD) & (col < PAD + W))
    mask = jnp.where(interior, 0.0, -jnp.inf).astype(jnp.float32).reshape(1, Lp)

    kernel = functools.partial(_spp_kernel, Wp=Wp)

    # VMEM budget from actual buffer sizes (double-buffered I/O + scratch +
    # headroom for intermediates), floored at the default scoped limit.
    in_block = 4 * (Cin * Lp + Lp + C * Cin + C + Cout * 4 * C + Cout)
    out_block = 4 * Cout * LG
    scratch_b = 4 * 4 * C * LG
    vmem_limit = int(min(128 * 2 ** 20,
                         max(32 * 2 ** 20,
                             8 * (in_block + out_block + scratch_b))))

    out = pl.pallas_call(
        kernel,
        grid=(B,),
        in_specs=[
            pl.BlockSpec((1, Cin, Lp), lambda b: (b, 0, 0)),
            pl.BlockSpec((1, Lp), lambda b: (0, 0)),
            pl.BlockSpec((C, Cin), lambda b: (0, 0)),
            pl.BlockSpec((C, 1), lambda b: (0, 0)),
            pl.BlockSpec((Cout, 4 * C), lambda b: (0, 0)),
            pl.BlockSpec((Cout, 1), lambda b: (0, 0)),
        ],
        out_specs=pl.BlockSpec((1, Cout, LG), lambda b: (b, 0, 0)),
        out_shape=jax.ShapeDtypeStruct((B, Cout, LG), jnp.float32),
        scratch_shapes=[pltpu.VMEM((4 * C, LG), jnp.float32)],
        compiler_params=pltpu.CompilerParams(
            dimension_semantics=("parallel",),
            vmem_limit_bytes=vmem_limit),
    )(xp, mask, params['w1t'], params['b1'], params['w2t'], params['b2'])

    # (B, Cout, H*Wp) -> NCHW, dropping the junk right-pad columns.
    return out.reshape(B, Cout, H, Wp)[:, :, :, :W]


# ----------------------------------------------------------------------------
# Parameter construction (deterministic; BatchNorm folded in eval-mode form)
# ----------------------------------------------------------------------------
def _fold_bn(w_oc, gamma, beta, mean, var, eps=1e-5):
    # w_oc: (Cout, Cin) 1x1 conv weight -> folded weight (Cout, Cin), bias (Cout, 1)
    scale = gamma / jnp.sqrt(var + eps)
    return w_oc * scale[:, None], (beta - mean * scale).reshape(-1, 1)


def make_params(key, cin, cout, hidden):
    keys = iter(jax.random.split(key, 12))

    def nrm(shape, s=0.1):
        return s * jax.random.normal(next(keys), shape, jnp.float32)

    def bn_stats(c):
        gamma = 1.0 + 0.1 * jax.random.normal(next(keys), (c,), jnp.float32)
        beta = 0.1 * jax.random.normal(next(keys), (c,), jnp.float32)
        mean = 0.1 * jax.random.normal(next(keys), (c,), jnp.float32)
        var = 1.0 + 0.1 * jax.random.uniform(next(keys), (c,), jnp.float32)
        return gamma, beta, mean, var

    P = {}
    w1 = nrm((hidden, cin))                      # conv1: 1x1, cin -> hidden
    P['w1t'], P['b1'] = _fold_bn(w1, *bn_stats(hidden))
    w2 = nrm((cout, 4 * hidden))                 # conv2: 1x1, 4*hidden -> cout
    P['w2t'], P['b2'] = _fold_bn(w2, *bn_stats(cout))
    return P


# ----------------------------------------------------------------------------
# Pure-JAX reference (correctness check only), NCHW like the PyTorch module
# ----------------------------------------------------------------------------
def ref_forward(x, P):
    def silu(v):
        return v * jax.nn.sigmoid(v)

    def pw(v, wt, b):
        return silu(jnp.einsum('oc,bchw->bohw', wt, v) + b.reshape(1, -1, 1, 1))

    def mpool(v, k):                             # stride 1, pad k//2, -inf pad
        return jax.lax.reduce_window(v, -jnp.inf, jax.lax.max,
                                     (1, 1, k, k), (1, 1, 1, 1), 'SAME')

    x1 = pw(x, P['w1t'], P['b1'])
    cat = jnp.concatenate([x1, mpool(x1, 5), mpool(x1, 9), mpool(x1, 13)],
                          axis=1)
    return pw(cat, P['w2t'], P['b2'])


if __name__ == "__main__":
    B, Cin, H, W = 2, 32, 16, 16                 # NCHW, as in the PyTorch module
    Cout = 32
    hidden = Cin // 2                            # hidden_channels = in_channels // 2

    key = jax.random.PRNGKey(0)
    kx, kp = jax.random.split(key)
    x = jax.random.normal(kx, (B, Cin, H, W), jnp.float32)
    params = make_params(kp, Cin, Cout, hidden)

    fwd = jax.jit(spp_bottleneck_forward)
    out = fwd(x, params)
    jax.block_until_ready(out)

    ref = ref_forward(x, params)
    assert out.shape == (B, Cout, H, W)
    assert bool(jnp.allclose(out, ref, atol=1e-3, rtol=1e-3)), \
        "Pallas SPPBottleneck output mismatch vs JAX reference"

    print("KERNEL_OK")
</pallas_src>

<mosaic_0001>
module attributes {stable_mosaic.version = 11 : i64} {
  func.func @_spp_kernel(%arg0: i32, %arg1: memref<1x32x928xf32, #tpu.memory_space<vmem>>, %arg2: memref<1x928xf32, #tpu.memory_space<vmem>>, %arg3: memref<16x32xf32, #tpu.memory_space<vmem>>, %arg4: memref<16x1xf32, #tpu.memory_space<vmem>>, %arg5: memref<32x64xf32, #tpu.memory_space<vmem>>, %arg6: memref<32x1xf32, #tpu.memory_space<vmem>>, %arg7: memref<1x32x512xf32, #tpu.memory_space<vmem>>, %arg8: memref<64x512xf32, #tpu.memory_space<vmem>>) attributes {dimension_semantics = [#tpu.dimension_semantics<parallel>], iteration_bounds = array<i64: 2>, scalar_prefetch = 0 : i64, scratch_operands = 1 : i64, tpu.core_type = #tpu.core_type<tc>, window_params = [{transform_indices = @transform_0, window_bounds = array<i64: 1, 32, 928>}, {pipeline_mode = #tpu.pipeline_mode<synchronous>, transform_indices = @transform_1, window_bounds = array<i64: 1, 928>}, {pipeline_mode = #tpu.pipeline_mode<synchronous>, transform_indices = @transform_2, window_bounds = array<i64: 16, 32>}, {pipeline_mode = #tpu.pipeline_mode<synchronous>, transform_indices = @transform_3, window_bounds = array<i64: 16, 1>}, {pipeline_mode = #tpu.pipeline_mode<synchronous>, transform_indices = @transform_4, window_bounds = array<i64: 32, 64>}, {pipeline_mode = #tpu.pipeline_mode<synchronous>, transform_indices = @transform_5, window_bounds = array<i64: 32, 1>}, {transform_indices = @transform_6, window_bounds = array<i64: 1, 32, 512>}]} {
    %c0 = arith.constant 0 : index
    %c0_0 = arith.constant 0 : index
    %0 = vector.load %arg3[%c0, %c0_0] : memref<16x32xf32, #tpu.memory_space<vmem>>, vector<16x32xf32>
    %c0_1 = arith.constant 0 : index
    %c0_2 = arith.constant 0 : index
    %c0_3 = arith.constant 0 : index
    %1 = vector.load %arg1[%c0_1, %c0_2, %c0_3] : memref<1x32x928xf32, #tpu.memory_space<vmem>>, vector<1x32x928xf32>
    %2 = vector.shape_cast %1 : vector<1x32x928xf32> to vector<32x928xf32>
    %cst = arith.constant dense<0.000000e+00> : vector<16x928xf32>
    %3 = tpu.matmul %0, %2, %cst {dimension_numbers = #tpu.dot_dimension_numbers<[1], [0], [0], [1], [0, 0, 1, 1], [], []>} : vector<16x32xf32>, vector<32x928xf32>, vector<16x928xf32> -> vector<16x928xf32>
    %c0_4 = arith.constant 0 : index
    %c0_5 = arith.constant 0 : index
    %4 = vector.load %arg4[%c0_4, %c0_5] : memref<16x1xf32, #tpu.memory_space<vmem>>, vector<16x1xf32>
    %5 = vector.broadcast %4 : vector<16x1xf32> to vector<16x928xf32>
    %6 = arith.addf %3, %5 : vector<16x928xf32>
    %7 = arith.negf %6 : vector<16x928xf32>
    %8 = math.exp %7 : vector<16x928xf32>
    %cst_6 = arith.constant 1.000000e+00 : f32
    %9 = vector.broadcast %cst_6 : f32 to vector<16x928xf32>
    %10 = arith.addf %9, %8 : vector<16x928xf32>
    %11 = arith.divf %9, %10 : vector<16x928xf32>
    %12 = arith.mulf %6, %11 : vector<16x928xf32>
    %c0_7 = arith.constant 0 : index
    %c0_8 = arith.constant 0 : index
    %13 = vector.load %arg2[%c0_7, %c0_8] : memref<1x928xf32, #tpu.memory_space<vmem>>, vector<1x928xf32>
    %14 = vector.broadcast %13 : vector<1x928xf32> to vector<16x928xf32>
    %15 = arith.addf %12, %14 : vector<16x928xf32>
    %16 = vector.extract_strided_slice %15 {offsets = [0, 0], sizes = [16, 924], strides = [1, 1]} : vector<16x928xf32> to vector<16x924xf32>
    %17 = vector.extract_strided_slice %15 {offsets = [0, 1], sizes = [16, 924], strides = [1, 1]} : vector<16x928xf32> to vector<16x924xf32>
    %18 = arith.maximumf %16, %17 : vector<16x924xf32>
    %19 = vector.extract_strided_slice %15 {offsets = [0, 2], sizes = [16, 924], strides = [1, 1]} : vector<16x928xf32> to vector<16x924xf32>
    %20 = arith.maximumf %18, %19 : vector<16x924xf32>
    %21 = vector.extract_strided_slice %15 {offsets = [0, 3], sizes = [16, 924], strides = [1, 1]} : vector<16x928xf32> to vector<16x924xf32>
    %22 = arith.maximumf %20, %21 : vector<16x924xf32>
    %23 = vector.extract_strided_slice %15 {offsets = [0, 4], sizes = [16, 924], strides = [1, 1]} : vector<16x928xf32> to vector<16x924xf32>
    %24 = arith.maximumf %22, %23 : vector<16x924xf32>
    %25 = vector.extract_strided_slice %24 {offsets = [0, 0], sizes = [16, 796], strides = [1, 1]} : vector<16x924xf32> to vector<16x796xf32>
    %26 = vector.extract_strided_slice %24 {offsets = [0, 32], sizes = [16, 796], strides = [1, 1]} : vector<16x924xf32> to vector<16x796xf32>
    %27 = arith.maximumf %25, %26 : vector<16x796xf32>
    %28 = vector.extract_strided_slice %24 {offsets = [0, 64], sizes = [16, 796], strides = [1, 1]} : vector<16x924xf32> to vector<16x796xf32>
    %29 = arith.maximumf %27, %28 : vector<16x796xf32>
    %30 = vector.extract_strided_slice %24 {offsets = [0, 96], sizes = [16, 796], strides = [1, 1]} : vector<16x924xf32> to vector<16x796xf32>
    %31 = arith.maximumf %29, %30 : vector<16x796xf32>
    %32 = vector.extract_strided_slice %24 {offsets = [0, 128], sizes = [16, 796], strides = [1, 1]} : vector<16x924xf32> to vector<16x796xf32>
    %33 = arith.maximumf %31, %32 : vector<16x796xf32>
    %34 = vector.extract_strided_slice %33 {offsets = [0, 0], sizes = [16, 792], strides = [1, 1]} : vector<16x796xf32> to vector<16x792xf32>
    %35 = vector.extract_strided_slice %33 {offsets = [0, 1], sizes = [16, 792], strides = [1, 1]} : vector<16x796xf32> to vector<16x792xf32>
    %36 = arith.maximumf %34, %35 : vector<16x792xf32>
    %37 = vector.extract_strided_slice %33 {offsets = [0, 2], sizes = [16, 792], strides = [1, 1]} : vector<16x796xf32> to vector<16x792xf32>
    %38 = arith.maximumf %36, %37 : vector<16x792xf32>
    %39 = vector.extract_strided_slice %33 {offsets = [0, 3], sizes = [16, 792], strides = [1, 1]} : vector<16x796xf32> to vector<16x792xf32>
    %40 = arith.maximumf %38, %39 : vector<16x792xf32>
    %41 = vector.extract_strided_slice %33 {offsets = [0, 4], sizes = [16, 792], strides = [1, 1]} : vector<16x796xf32> to vector<16x792xf32>
    %42 = arith.maximumf %40, %41 : vector<16x792xf32>
    %43 = vector.extract_strided_slice %42 {offsets = [0, 0], sizes = [16, 664], strides = [1, 1]} : vector<16x792xf32> to vector<16x664xf32>
    %44 = vector.extract_strided_slice %42 {offsets = [0, 32], sizes = [16, 664], strides = [1, 1]} : vector<16x792xf32> to vector<16x664xf32>
    %45 = arith.maximumf %43, %44 : vector<16x664xf32>
    %46 = vector.extract_strided_slice %42 {offsets = [0, 64], sizes = [16, 664], strides = [1, 1]} : vector<16x792xf32> to vector<16x664xf32>
    %47 = arith.maximumf %45, %46 : vector<16x664xf32>
    %48 = vector.extract_strided_slice %42 {offsets = [0, 96], sizes = [16, 664], strides = [1, 1]} : vector<16x792xf32> to vector<16x664xf32>
    %49 = arith.maximumf %47, %48 : vector<16x664xf32>
    %50 = vector.extract_strided_slice %42 {offsets = [0, 128], sizes = [16, 664], strides = [1, 1]} : vector<16x792xf32> to vector<16x664xf32>
    %51 = arith.maximumf %49, %50 : vector<16x664xf32>
    %52 = vector.extract_strided_slice %51 {offsets = [0, 0], sizes = [16, 660], strides = [1, 1]} : vector<16x664xf32> to vector<16x660xf32>
    %53 = vector.extract_strided_slice %51 {offsets = [0, 1], sizes = [16, 660], strides = [1, 1]} : vector<16x664xf32> to vector<16x660xf32>
    %54 = arith.maximumf %52, %53 : vector<16x660xf32>
    %55 = vector.extract_strided_slice %51 {offsets = [0, 2], sizes = [16, 660], strides = [1, 1]} : vector<16x664xf32> to vector<16x660xf32>
    %56 = arith.maximumf %54, %55 : vector<16x660xf32>
    %57 = vector.extract_strided_slice %51 {offsets = [0, 3], sizes = [16, 660], strides = [1, 1]} : vector<16x664xf32> to vector<16x660xf32>
    %58 = arith.maximumf %56, %57 : vector<16x660xf32>
    %59 = vector.extract_strided_slice %51 {offsets = [0, 4], sizes = [16, 660], strides = [1, 1]} : vector<16x664xf32> to vector<16x660xf32>
    %60 = arith.maximumf %58, %59 : vector<16x660xf32>
    %61 = vector.extract_strided_slice %60 {offsets = [0, 0], sizes = [16, 532], strides = [1, 1]} : vector<16x660xf32> to vector<16x532xf32>
    %62 = vector.extract_strided_slice %60 {offsets = [0, 32], sizes = [16, 532], strides = [1, 1]} : vector<16x660xf32> to vector<16x532xf32>
    %63 = arith.maximumf %61, %62 : vector<16x532xf32>
    %64 = vector.extract_strided_slice %60 {offsets = [0, 64], sizes = [16, 532], strides = [1, 1]} : vector<16x660xf32> to vector<16x532xf32>
    %65 = arith.maximumf %63, %64 : vector<16x532xf32>
    %66 = vector.extract_strided_slice %60 {offsets = [0, 96], sizes = [16, 532], strides = [1, 1]} : vector<16x660xf32> to vector<16x532xf32>
    %67 = arith.maximumf %65, %66 : vector<16x532xf32>
    %68 = vector.extract_strided_slice %60 {offsets = [0, 128], sizes = [16, 532], strides = [1, 1]} : vector<16x660xf32> to vector<16x532xf32>
    %69 = arith.maximumf %67, %68 : vector<16x532xf32>
    %70 = vector.extract_strided_slice %15 {offsets = [0, 198], sizes = [16, 512], strides = [1, 1]} : vector<16x928xf32> to vector<16x512xf32>
    %c0_9 = arith.constant 0 : index
    %c0_10 = arith.constant 0 : index
    %71 = vector.load %arg8[%c0_9, %c0_10] : memref<64x512xf32, #tpu.memory_space<vmem>>, vector<16x512xf32>
    tpu.vector_store %arg8[%c0_9, %c0_10], %70 {strides = array<i32>} : memref<64x512xf32, #tpu.memory_space<vmem>>, vector<16x512xf32>,
    %72 = vector.extract_strided_slice %33 {offsets = [0, 132], sizes = [16, 512], strides = [1, 1]} : vector<16x796xf32> to vector<16x512xf32>
    %c16 = arith.constant 16 : index
    %c0_11 = arith.constant 0 : index
    %73 = vector.load %arg8[%c16, %c0_11] : memref<64x512xf32, #tpu.memory_space<vmem>>, vector<16x512xf32>
    tpu.vector_store %arg8[%c16, %c0_11], %72 {strides = array<i32>} : memref<64x512xf32, #tpu.memory_space<vmem>>, vector<16x512xf32>,
    %74 = vector.extract_strided_slice %51 {offsets = [0, 66], sizes = [16, 512], strides = [1, 1]} : vector<16x664xf32> to vector<16x512xf32>
    %c32 = arith.constant 32 : index
    %c0_12 = arith.constant 0 : index
    %75 = vector.load %arg8[%c32, %c0_12] : memref<64x512xf32, #tpu.memory_space<vmem>>, vector<16x512xf32>
    tpu.vector_store %arg8[%c32, %c0_12], %74 {strides = array<i32>} : memref<64x512xf32, #tpu.memory_space<vmem>>, vector<16x512xf32>,
    %76 = vector.extract_strided_slice %69 {offsets = [0, 0], sizes = [16, 512], strides = [1, 1]} : vector<16x532xf32> to vector<16x512xf32>
    %c48 = arith.constant 48 : index
    %c0_13 = arith.constant 0 : index
    %77 = vector.load %arg8[%c48, %c0_13] : memref<64x512xf32, #tpu.memory_space<vmem>>, vector<16x512xf32>
    tpu.vector_store %arg8[%c48, %c0_13], %76 {strides = array<i32>} : memref<64x512xf32, #tpu.memory_space<vmem>>, vector<16x512xf32>,
    %c0_14 = arith.constant 0 : index
    %c0_15 = arith.constant 0 : index
    %78 = vector.load %arg5[%c0_14, %c0_15] : memref<32x64xf32, #tpu.memory_space<vmem>>, vector<32x64xf32>
    %c0_16 = arith.constant 0 : index
    %c0_17 = arith.constant 0 : index
    %79 = vector.load %arg8[%c0_16, %c0_17] : memref<64x512xf32, #tpu.memory_space<vmem>>, vector<64x512xf32>
    %cst_18 = arith.constant dense<0.000000e+00> : vector<32x512xf32>
    %80 = tpu.matmul %78, %79, %cst_18 {dimension_numbers = #tpu.dot_dimension_numbers<[1], [0], [0], [1], [0, 0, 1, 1], [], []>} : vector<32x64xf32>, vector<64x512xf32>, vector<32x512xf32> -> vector<32x512xf32>
    %c0_19 = arith.constant 0 : index
    %c0_20 = arith.constant 0 : index
    %81 = vector.load %arg6[%c0_19, %c0_20] : memref<32x1xf32, #tpu.memory_space<vmem>>, vector<32x1xf32>
    %82 = vector.broadcast %81 : vector<32x1xf32> to vector<32x512xf32>
    %83 = arith.addf %80, %82 : vector<32x512xf32>
    %84 = arith.negf %83 : vector<32x512xf32>
    %85 = math.exp %84 : vector<32x512xf32>
    %cst_21 = arith.constant 1.000000e+00 : f32
    %86 = vector.broadcast %cst_21 : f32 to vector<32x512xf32>
    %87 = arith.addf %86, %85 : vector<32x512xf32>
    %88 = arith.divf %86, %87 : vector<32x512xf32>
    %89 = arith.mulf %83, %88 : vector<32x512xf32>
    %c0_22 = arith.constant 0 : index
    %c0_23 = arith.constant 0 : index
    %c0_24 = arith.constant 0 : index
    %90 = vector.load %arg7[%c0_22, %c0_23, %c0_24] : memref<1x32x512xf32, #tpu.memory_space<vmem>>, vector<1x32x512xf32>
    %91 = vector.shape_cast %90 : vector<1x32x512xf32> to vector<32x512xf32>
    %92 = vector.shape_cast %89 : vector<32x512xf32> to vector<1x32x512xf32>
    tpu.vector_store %arg7[%c0_22, %c0_23, %c0_24], %92 {strides = array<i32>} : memref<1x32x512xf32, #tpu.memory_space<vmem>>, vector<1x32x512xf32>,
    return
  }
  func.func @transform_0(%arg0: i32) -> (i32, i32, i32) {
    %c0_i32 = arith.constant 0 : i32
    %c0_i32_0 = arith.constant 0 : i32
    %c0_i32_1 = arith.constant 0 : i32
    return %arg0, %c0_i32, %c0_i32_0 : i32, i32, i32
  }
  func.func @transform_1(%arg0: i32) -> (i32, i32) {
    %c0_i32 = arith.constant 0 : i32
    %c0_i32_0 = arith.constant 0 : i32
    %c0_i32_1 = arith.constant 0 : i32
    return %c0_i32, %c0_i32_0 : i32, i32
  }
  func.func @transform_2(%arg0: i32) -> (i32, i32) {
    %c0_i32 = arith.constant 0 : i32
    %c0_i32_0 = arith.constant 0 : i32
    %c0_i32_1 = arith.constant 0 : i32
    return %c0_i32, %c0_i32_0 : i32, i32
  }
  func.func @transform_3(%arg0: i32) -> (i32, i32) {
    %c0_i32 = arith.constant 0 : i32
    %c0_i32_0 = arith.constant 0 : i32
    %c0_i32_1 = arith.constant 0 : i32
    return %c0_i32, %c0_i32_0 : i32, i32
  }
  func.func @transform_4(%arg0: i32) -> (i32, i32) {
    %c0_i32 = arith.constant 0 : i32
    %c0_i32_0 = arith.constant 0 : i32
    %c0_i32_1 = arith.constant 0 : i32
    return %c0_i32, %c0_i32_0 : i32, i32
  }
  func.func @transform_5(%arg0: i32) -> (i32, i32) {
    %c0_i32 = arith.constant 0 : i32
    %c0_i32_0 = arith.constant 0 : i32
    %c0_i32_1 = arith.constant 0 : i32
    return %c0_i32, %c0_i32_0 : i32, i32
  }
  func.func @transform_6(%arg0: i32) -> (i32, i32, i32) {
    %c0_i32 = arith.constant 0 : i32
    %c0_i32_0 = arith.constant 0 : i32
    %c0_i32_1 = arith.constant 0 : i32
    return %arg0, %c0_i32, %c0_i32_0 : i32, i32, i32
  }
}

</mosaic_0001>

<bundles_post_ra>
// kernel: spp_bottleneck_forward.1
= control target key start
LH: loop header
LB: loop body
LE: loop exit
PB: predicated region body
PF: predicated region fallthrough
CT: control target
= control target key end

     0   :  { %s3818_s21 = smov 0   ;;  %s5598_s0 = inlined_call_operand.vmem [shape: f32[2,32,928], index: 0, kind: input, shape index: {}]   ;;  %s5599_s1 = inlined_call_operand.vmem [shape: f32[1,928], index: 1, kind: input, shape index: {}]   ;;  %s5600_s2 = inlined_call_operand.vmem [shape: f32[16,32], index: 2, kind: input, shape index: {}]   ;;  %s5601_s3 = inlined_call_operand.vmem [shape: f32[16,1], index: 3, kind: input, shape index: {}]   ;;  %s5602_s4 = inlined_call_operand.vmem [shape: f32[32,64], index: 4, kind: input, shape index: {}]   ;;  %s5603_s5 = inlined_call_operand.vmem [shape: f32[32,1], index: 5, kind: input, shape index: {}]   ;;  %s5604_s6 = inlined_call_operand.vmem [shape: f32[2,32,512], index: 6, kind: output, shape index: {}]  }
   0x1 LB: > { %s2750_s22 = sadd.s32 4294967295, %s3770_s21   ;;  %p2754_p0 = scmp.ge.s32.totalorder %s3770_s21, 1  ;;  %s3770_s21 = sphi %s3818_s21, %s16_s21  }
   0x2   : > { %p212_p1 = scmp.lt.s32.totalorder %s3770_s21, 3 }
   0x4   : > { %p213_p2 = pnand %p2754_p0, %p212_p1 }
   0x6   : > { %216 = sbr.rel (%p213_p2) target bundleno = 1520 (0x5f0), region = 44 }
   0xd   : > { %p242_p3 = scmp.lt.s32.totalorder %s2750_s22, 1  ;;  %v5605_v0 = vmov 0.0   ;;  %v286_v1 = vld [vmem:[%s5601_s3] sm:$0xff]  ;;  %v3773_v2 = vmov 0   ;;  %v287_v3 = vld [vmem:[%s5601_s3 + $0x8] sm:$0xff]  ;;  %vm298_vm0 = vcmask 261120  }
   0xe   : > { %369 = vmatprep.mubr.f32.mxu0 %v5605_v0  ;;  %446 = vmatprep.mubr.f32.mxu1 %v5605_v0  ;;  %v252_v30 = vld [vmem:[%s5600_s2] sm:$0xff]  ;;  %v253_v51 = vld [vmem:[%s5600_s2 + $0x8] sm:$0xff]  ;;  %s3774_s13 = smov 126   ;;  %s3775_s14 = smov 127   ;;  %vm831_vm1 = vcmask 1039360   ;;  %vm910_vm2 = vcmask 1031168  }
   0xf   : > { %s5689_s22 = smov (!%p242_p3, %s2750_s22), 1  ;;  %2894 = vset.pattern.permute.xlu0 %v3773_v2  ;;  %3635 = vset.pattern.permute.xlu1 %v3773_v2  ;;  %s3776_s15 = smov 125   ;;  %vm989_vm3 = vcmask 1022976   ;;  %vm1068_vm4 = vcmask 1014784   ;;  %vm1157_vm5 = vcmask 785408   ;;  %vm1226_vm6 = vcmask 523264  }
  0x10   : > { %290 = vperm.xlu0 %2894, %v286_v1   ;;  %s2809_s25 = sshll.u32 %s5689_s22, 8  ;;  %s3777_s16 = smov 124   ;;  %vm2231_vm7 = vcmask 474112   ;;  %vm2284_vm8 = vcmask 506880  }
  0x11   : > { %s3840_s30 = scalar_lea.vmem %s5598_s0, %s2809_s25  ;;  %s3778_s17 = smov 64  }
  0x12   : > { %v255_v4 = vld [vmem:[%s3840_s30 + $0x8] sm:$0xff]  ;;  %v257_v6 = vld [vmem:[%s3840_s30 + $0x18] sm:$0xff]  ;;  %v254_v9 = vld [vmem:[%s3840_s30] sm:$0xff]  ;;  %s3779_s18 = smov 96   ;;  %s3780_s19 = smov 32  }
  0x13   : > { %v263_v5 = vld [vmem:[%s3840_s30 + $0x48] sm:$0xff]  ;;  %v265_v8 = vld [vmem:[%s3840_s30 + $0x58] sm:$0xff]  ;;  %v262_v10 = vld [vmem:[%s3840_s30 + $0x40] sm:$0xff]  ;;  %s3781_s20 = smov 58   ;;  %s3782_s23 = smov 62  }
  0x14   : > { %v2811_v7 = vpack.c.bf16 %v263_v5, %v255_v4  ;;  %295 = vperm.xlu0 %2894, %v287_v3   ;;  %v2819_v11 = vpack.c.bf16 %v265_v8, %v257_v6  ;;  %v2813_v12 = vpack.c.bf16 %v262_v10, %v254_v9  ;;  %v256_v13 = vld [vmem:[%s3840_s30 + $0x10] sm:$0xff]  ;;  %v271_v15 = vld [vmem:[%s3840_s30 + $0x88] sm:$0xff]  ;;  %v273_v18 = vld [vmem:[%s3840_s30 + $0x98] sm:$0xff] }
  0x15   : > { %v264_v14 = vld [vmem:[%s3840_s30 + $0x50] sm:$0xff]  ;;  %v279_v17 = vld [vmem:[%s3840_s30 + $0xc8] sm:$0xff]  ;;  %v281_v19 = vld [vmem:[%s3840_s30 + $0xd8] sm:$0xff] }
  0x16   : > { %2812 = vmatprep.subr.bf16.mxu0 %v2811_v7  ;;  %v2821_v16 = vpack.c.bf16 %v264_v14, %v256_v13  ;;  %2820 = vmatprep.subr.bf16.mxu1 %v2819_v11  ;;  %v2815_v20 = vpack.c.bf16 %v279_v17, %v271_v15  ;;  %v2823_v21 = vpack.c.bf16 %v281_v19, %v273_v18  ;;  %v270_v22 = vld [vmem:[%s3840_s30 + $0x80] sm:$0xff]  ;;  %v272_v24 = vld [vmem:[%s3840_s30 + $0x90] sm:$0xff]  ;;  %v259_v27 = vld [vmem:[%s3840_s30 + $0x28] sm:$0xff] }
  0x17   : > { %2814 = vmatpush1.bf16.msra.mxu0 %v2813_v12  ;;  %v278_v23 = vld [vmem:[%s3840_s30 + $0xc0] sm:$0xff]  ;;  %v280_v26 = vld [vmem:[%s3840_s30 + $0xd0] sm:$0xff]  ;;  %v267_v28 = vld [vmem:[%s3840_s30 + $0x68] sm:$0xff] }
  0x18   : > { %2822 = vmatpush1.bf16.msra.mxu1 %v2821_v16  ;;  %v2817_v25 = vpack.c.bf16 %v278_v23, %v270_v22  ;;  %2816 = vmatprep.subr.bf16.mxu0 %v2815_v20  ;;  %v2825_v29 = vpack.c.bf16 %v280_v26, %v272_v24  ;;  %v2827_v31 = vpack.c.bf16 %v267_v28, %v259_v27  ;;  %v261_v32 = vld [vmem:[%s3840_s30 + $0x38] sm:$0xff]  ;;  %v258_v34 = vld [vmem:[%s3840_s30 + $0x20] sm:$0xff]  ;;  %v260_v37 = vld [vmem:[%s3840_s30 + $0x30] sm:$0xff] }
  0x19   : > { %2824 = vmatprep.subr.bf16.mxu1 %v2823_v21  ;;  %v269_v33 = vld [vmem:[%s3840_s30 + $0x78] sm:$0xff]  ;;  %v266_v36 = vld [vmem:[%s3840_s30 + $0x60] sm:$0xff]  ;;  %v268_v38 = vld [vmem:[%s3840_s30 + $0x70] sm:$0xff] }
  0x1a   : > { %v2835_v35 = vpack.c.bf16 %v269_v33, %v261_v32  ;;  %v2829_v39 = vpack.c.bf16 %v266_v36, %v258_v34  ;;  %v275_v40 = vld [vmem:[%s3840_s30 + $0xa8] sm:$0xff]  ;;  %v277_v42 = vld [vmem:[%s3840_s30 + $0xb8] sm:$0xff]  ;;  %v2837_v43 = vpack.c.bf16 %v268_v38, %v260_v37  ;;  %v274_v45 = vld [vmem:[%s3840_s30 + $0xa0] sm:$0xff] }
  0x1b   : > { %2818 = vmatpush1.bf16.msra.mxu0 %v2817_v25  ;;  %v283_v41 = vld [vmem:[%s3840_s30 + $0xe8] sm:$0xff]  ;;  %v285_v44 = vld [vmem:[%s3840_s30 + $0xf8] sm:$0xff]  ;;  %v282_v46 = vld [vmem:[%s3840_s30 + $0xe0] sm:$0xff] }
  0x1c   : > { %2826 = vmatpush1.bf16.msra.mxu1 %v2825_v29  ;;  %2828 = vmatprep.subr.bf16.mxu0 %v2827_v31  ;;  %v2831_v47 = vpack.c.bf16 %v283_v41, %v275_v40  ;;  %v276_v48 = vld [vmem:[%s3840_s30 + $0xb0] sm:$0xff]  ;;  %v2839_v50 = vpack.c.bf16 %v285_v44, %v277_v42  ;;  %v2833_v52 = vpack.c.bf16 %v282_v46, %v274_v45  ;;  %v727_v29 = vlaneseq }
  0x1d   : > { %2836 = vmatprep.subr.bf16.mxu1 %v2835_v35  ;;  %v284_v49 = vld [vmem:[%s3840_s30 + $0xf0] sm:$0xff] }
  0x1e   : > { %2759 = vmatmul.mubr.msk.f32.vlgmr.msra.gmra.mrb[0].mxu0 %vm298_vm0, %v252_v30  ;;  %v2841_v53 = vpack.c.bf16 %v284_v49, %v276_v48  ;;  %v3934_v37 = vshrl.u32 %v727_v29, 7  ;;  %v3946_v48 = vld [vmem:[%s5599_s1] sm:$0xff] }
  0x1f   : > { %2761 = vmatmul.mubr.msk.f32.vlgmr.msra.gmra.mrb[0].mxu1 %vm298_vm0, %v252_v30  ;;  %2830 = vmatpush1.bf16.msra.mxu0 %v2829_v39 }
  0x20   : > { %2838 = vmatpush1.bf16.msra.mxu1 %v2837_v43  ;;  %375 = vmatprep.mubr.f32.mxu0 %v5605_v0  ;;  %v737_v46 = vsub.s32 2, %v3934_v37  ;;  %v733_v49 = vsub.s32 1, %v3934_v37  ;;  %v745_v29 = vsub.s32 4, %v3934_v37 }
  0x21   : > { %452 = vmatprep.mubr.f32.mxu1 %v5605_v0  ;;  %2832 = vmatprep.subr.bf16.mxu0 %v2831_v47 }
  0x22   : > { %2760 = vmatmul.mubr.msk.f32.gmra.mrb[2].mxu0 %vm298_vm0, %v253_v51  ;;  %2840 = vmatprep.subr.bf16.mxu1 %v2839_v50 }
  0x23   : > { %2762 = vmatmul.mubr.msk.f32.gmra.mrb[2].mxu1 %vm298_vm0, %v253_v51  ;;  %2834 = vmatpush1.bf16.msra.mxu0 %v2833_v52  ;;  %v729_v52 = vsub.s32 0, %v3934_v37 }
  0x24   : > { %2842 = vmatpush1.bf16.msra.mxu1 %v2841_v53  ;;  %523 = vmatprep.mubr.f32.mxu0 %v5605_v0 }
  0x25   : > { %600 = vmatprep.mubr.f32.mxu1 %v5605_v0 }
  0x26   : > { %2763 = vmatmul.mubr.msk.f32.vlgmr.msra.gmra.mrb[4].mxu0 %vm298_vm0, %v252_v30 }
  0x27   : > { %2765 = vmatmul.mubr.msk.f32.vlgmr.msra.gmra.mrb[4].mxu1 %vm298_vm0, %v252_v30  ;;  %529 = vmatprep.mubr.f32.mxu0 %v5605_v0 }
  0x28   : > { %606 = vmatprep.mubr.f32.mxu1 %v5605_v0 }
  0x2a   : > { %2764 = vmatmul.mubr.msk.f32.gmra.mrb[6].mxu0 %vm298_vm0, %v253_v51 }
  0x2b   : > { %2766 = vmatmul.mubr.msk.f32.gmra.mrb[6].mxu1 %vm298_vm0, %v253_v51  ;;  %2453 = vmatprep.mubr.f32.mxu0 %v5605_v0 }
  0x2c   : > { %2542 = vmatprep.mubr.f32.mxu1 %v5605_v0 }
  0x8f   : > { %v291_v54 = vpop.permute.xlu0 %290 }
  0x93   : > { %v3904_v1 = vpop.permute.xlu0 %295 }
  0xf1   : > { %v371_v55 = vpop.f32.mrb[0].mxu0 }
  0xf2   : > { %v3896_v56 = vadd.f32 %v371_v55, %v291_v54  ;;  %v448_v57 = vpop.f32.mrb[0].mxu1  ;;  %v373_v58 = vpop.f32.mrb[1].mxu0  ;;  %v738_v55 = vrot.slane %v3946_v48, %v737_v46 }
  0xf3   : > { %v3898_v59 = vadd.f32 %v448_v57, %v291_v54  ;;  %v3900_v60 = vadd.f32 %v373_v58, %v291_v54  ;;  %v450_v61 = vpop.f32.mrb[1].mxu1 }
  0xf4   : > { %v2767_v62 = vmul.f32 -1.442695, %v3896_v56  ;;  %v3913_v9 = vadd.f32 %v450_v61, %v291_v54  ;;  %v3954_v61 = vrot.slane %v3946_v48, %v733_v49 }
  0xf5   : > { %v2769_v63 = vmul.f32 -1.442695, %v3898_v59  ;;  %v2768_v2 = vmul.f32 -1.442695, %v3900_v60  ;;  %v377_v3 = vpop.f32.mrb[2].mxu0 }
  0xf6   : > { %3636 = vpow2.f32 %v2767_v62  ;;  %v3908_v4 = vadd.f32 %v377_v3, %v3904_v1  ;;  %v454_v5 = vpop.f32.mrb[2].mxu1  ;;  %v379_v6 = vpop.f32.mrb[3].mxu0  ;;  %v2770_v19 = vmul.f32 -1.442695, %v3913_v9 }
  0xf7   : > { %3638 = vpow2.f32 %v2769_v63  ;;  %v3911_v7 = vadd.f32 %v454_v5, %v3904_v1  ;;  %v456_v8 = vpop.f32.mrb[3].mxu1  ;;  %v3940_v44 = vadd.f32 %v379_v6, %v3904_v1  ;;  %v730_v5 = vrot.slane %v3946_v48, %v729_v52 }
  0xf8   : > { %3640 = vpow2.f32 %v2768_v2  ;;  %v2775_v10 = vmul.f32 -1.442695, %v3908_v4  ;;  %v3917_v11 = vadd.f32 %v456_v8, %v3904_v1  ;;  %v749_v52 = vsub.s32 5, %v3934_v37 }
  0xf9   : > { %v2777_v12 = vmul.f32 -1.442695, %v3911_v7  ;;  %v525_v13 = vpop.f32.mrb[4].mxu0  ;;  %v2776_v53 = vmul.f32 -1.442695, %v3940_v44 }
  0xfa   : > { %3642 = vpow2.f32 %v2775_v10  ;;  %v2778_v14 = vmul.f32 -1.442695, %v3917_v11  ;;  %v3921_v15 = vadd.f32 %v525_v13, %v291_v54  ;;  %v602_v16 = vpop.f32.mrb[4].mxu1  ;;  %v527_v17 = vpop.f32.mrb[5].mxu0 }
  0xfb   : > { %3644 = vpow2.f32 %v2777_v12  ;;  %v604_v18 = vpop.f32.mrb[5].mxu1  ;;  %v3927_v22 = vadd.f32 %v602_v16, %v291_v54  ;;  %v3931_v30 = vadd.f32 %v527_v17, %v291_v54 }
  0xfc   : > { %v2771_v20 = vmul.f32 -1.442695, %v3921_v15  ;;  %3646 = vpow2.f32 %v2778_v14  ;;  %v3937_v41 = vadd.f32 %v604_v18, %v291_v54 }
  0xfd   : > { %v3925_v21 = vpop.f32.mrb[6].mxu0  ;;  %v2773_v33 = vmul.f32 -1.442695, %v3927_v22  ;;  %v2772_v39 = vmul.f32 -1.442695, %v3931_v30 }
  0xfe   : > { %3648 = vpow2.f32 %v2771_v20  ;;  %v608_v23 = vpop.f32.mrb[6].mxu1  ;;  %v3929_v24 = vpop.f32.mrb[7].mxu0  ;;  %v2774_v50 = vmul.f32 -1.442695, %v3937_v41 }
  0xff   : > { %v610_v25 = vpop.f32.mrb[7].mxu1  ;;  %3650 = vpow2.f32 %v2770_v19  ;;  %v3963_v12 = vadd.f32 %v608_v23, %v3904_v1  ;;  %v3980_v23 = vadd.f32 %v3925_v21, %v3904_v1 }
 0x100   : > { %v3637_v26 = vpop.eup %3636  ;;  %v3970_v14 = vadd.f32 %v610_v25, %v3904_v1  ;;  %v741_v25 = vsub.s32 3, %v3934_v37 }
 0x101   : > { %v3639_v27 = vpop.eup %3638  ;;  %v661_v28 = vadd.f32 1.0, %v3637_v26  ;;  %v3986_v26 = vadd.f32 %v3929_v24, %v3904_v1 }
 0x102   : > { %v3641_v31 = vpop.eup %3640  ;;  %v663_v32 = vadd.f32 1.0, %v3639_v27  ;;  %v2782_v27 = vmul.f32 -1.442695, %v3970_v14 }
 0x103   : > { %3652 = vrcp.f32 %v661_v28  ;;  %v662_v34 = vadd.f32 1.0, %v3641_v31 }
 0x104   : > { %v3643_v35 = vpop.eup %3642  ;;  %3654 = vrcp.f32 %v663_v32 }
 0x105   : > { %v3645_v36 = vpop.eup %3644  ;;  %3656 = vrcp.f32 %v662_v34  ;;  %v669_v38 = vadd.f32 1.0, %v3643_v35  ;;  %v742_v35 = vrot.slane %v3946_v48, %v741_v25 }
 0x106   : > { %v671_v40 = vadd.f32 1.0, %v3645_v36  ;;  %3658 = vpow2.f32 %v2773_v33  ;;  %v3647_v42 = vpop.eup %3646  ;;  %v2779_v33 = vmul.f32 -1.442695, %v3980_v23  ;;  %v2780_v36 = vmul.f32 -1.442695, %v3986_v26 }
 0x107   : > { %3660 = vrcp.f32 %v669_v38  ;;  %v672_v45 = vadd.f32 1.0, %v3647_v42 }
 0x108   : > { %v3649_v43 = vpop.eup %3648  ;;  %3662 = vpow2.f32 %v2772_v39 }
 0x109   : > { %v3651_v47 = vpop.eup %3650  ;;  %3664 = vrcp.f32 %v671_v40  ;;  %v665_v51 = vadd.f32 1.0, %v3649_v43 }
 0x10a   : > { %3666 = vrcp.f32 %v672_v45  ;;  %v664_v57 = vadd.f32 1.0, %v3651_v47 }
 0x10b   : > { %3668 = vpow2.f32 %v2774_v50  ;;  %v753_v50 = vsub.s32 6, %v3934_v37 }
 0x10c   : > { %3670 = vrcp.f32 %v665_v51 }
 0x10d   : > { %v3653_v54 = vpop.eup %3652  ;;  %3672 = vpow2.f32 %v2776_v53 }
 0x10e   : > { %v3655_v58 = vpop.eup %3654  ;;  %v709_v3 = vmul.f32 %v3653_v54, %v3896_v56  ;;  %3674 = vrcp.f32 %v664_v57 }
 0x10f   : > { %v3657_v62 = vpop.eup %3656  ;;  %v711_v63 = vmul.f32 %v3655_v58, %v3898_v59 }
 0x110   : > { %v3659_v2 = vpop.eup %3658  ;;  %v710_v6 = vmul.f32 %v3657_v62, %v3900_v60  ;;  %v3972_v60 = vadd.f32 %v730_v5, %v709_v3  ;;  %v754_v62 = vrot.slane %v3946_v48, %v753_v50 }
 0x111   : > { %v3661_v8 = vpop.eup %3660  ;;  %v3960_v10 = vadd.f32 %v738_v55, %v711_v63  ;;  %v667_v16 = vadd.f32 1.0, %v3659_v2  ;;  %v757_v63 = vsub.s32 7, %v3934_v37 }
 0x112   : > { %v3966_v13 = vadd.f32 %v3954_v61, %v710_v6  ;;  %v717_v59 = vmul.f32 %v3661_v8, %v3908_v4  ;;  %v3663_v56 = vpop.eup %3662  ;;  %v2781_v4 = vmul.f32 -1.442695, %v3963_v12  ;;  %v750_v6 = vrot.slane %v3946_v48, %v749_v52 }
 0x113   : > { %v3665_v17 = vpop.eup %3664  ;;  %v666_v31 = vadd.f32 1.0, %v3663_v56  ;;  %3676 = vrcp.f32 %v667_v16  ;;  %v758_v16 = vrot.slane %v3946_v48, %v757_v63 }
 0x114   : > { %5641 = vst [vmem:[#allocation3_spill] sm:$0xff] %v3966_v13  ;;  %v3974_v18 = vadd.f32 %v730_v5, %v717_v59  ;;  %v2900_v19 = vpack.i.bf16 %v3960_v10, %v3966_v13  ;;  %v3667_v20 = vpop.eup %3666  ;;  %v719_v28 = vmul.f32 %v3665_v17, %v3911_v7  ;;  %3678 = vpow2.f32 %v2781_v4 }
 0x115   : > { %v3669_v32 = vpop.eup %3668  ;;  %v720_v1 = vmul.f32 %v3667_v20, %v3917_v11  ;;  %3680 = vpow2.f32 %v2782_v27  ;;  %v4007_v11 = vrot.slane %v3946_v48, %v745_v29 }
 0x116   : > { %2901 = vrot.lane.b32.xlu0 %v2900_v19, %s3774_s13  ;;  %2896 = vrot.lane.b32.xlu1 %v2900_v19, %s3775_s14  ;;  %v3993_v21 = vpack.i.bf16 %v3974_v18, %v3972_v60  ;;  %v3671_v24 = vpop.eup %3670  ;;  %v4004_v38 = vadd.f32 %v738_v55, %v719_v28  ;;  %3682 = vrcp.f32 %v666_v31  ;;  %v668_v39 = vadd.f32 1.0, %v3669_v32 }
 0x117   : > { %v3673_v34 = vpop.eup %3672  ;;  %v4009_v40 = vadd.f32 %v742_v35, %v720_v1  ;;  %v713_v42 = vmul.f32 %v3671_v24, %v3921_v15  ;;  %3684 = vpow2.f32 %v2779_v33 }
 0x118   : > { %v3675_v7 = vpop.eup %3674  ;;  %v670_v43 = vadd.f32 1.0, %v3673_v34  ;;  %3686 = vpow2.f32 %v2780_v36 }
 0x119   : > { %v712_v45 = vmul.f32 %v3675_v7, %v3913_v9  ;;  %3688 = vrcp.f32 %v668_v39  ;;  %v4017_v46 = vadd.f32 %v4007_v11, %v713_v42  ;;  %v4021_v47 = vpack.i.bf16 %v4009_v40, %v4004_v38 }
 0x11a   : > { %2906 = vrot.lane.b32.xlu0 %v2900_v19, %s3776_s15  ;;  %2916 = vrot.lane.b32.xlu1 %v3993_v21, %s3775_s14  ;;  %3690 = vrcp.f32 %v670_v43 }
 0x11b   : > { %5642 = vst [vmem:[#allocation4_spill] sm:$0xff] %v4021_v47  ;;  %v4023_v49 = vadd.f32 %v742_v35, %v712_v45 }
 0x11d   : > { %v3677_v15 = vpop.eup %3676  ;;  %5643 = vst [vmem:[#allocation5_spill] sm:$0xff] %v4023_v49  ;;  %v2950_v53 = vpack.i.bf16 %v4017_v46, %v4023_v49 }
 0x11e   : > { %2911 = vrot.lane.b32.xlu0 %v2900_v19, %s3777_s16  ;;  %2921 = vrot.lane.b32.xlu1 %v3993_v21, %s3774_s13  ;;  %v3679_v9 = vpop.eup %3678  ;;  %v715_v58 = vmul.f32 %v3677_v15, %v3927_v22 }
 0x11f   : > { %v3681_v51 = vpop.eup %3680  ;;  %v675_v55 = vadd.f32 1.0, %v3679_v9 }
 0x120   : > { %v3683_v54 = vpop.eup %3682  ;;  %v676_v2 = vadd.f32 1.0, %v3681_v51  ;;  %v4044_v22 = vadd.f32 %v754_v62, %v715_v58 }
 0x121   : > { %v3685_v57 = vpop.eup %3684  ;;  %v714_v5 = vmul.f32 %v3683_v54, %v3931_v30  ;;  %3692 = vrcp.f32 %v675_v55 }
 0x122   : > { %2931 = vrot.lane.b32.xlu0 %v4021_v47, %s3775_s14  ;;  %2926 = vrot.lane.b32.xlu1 %v3993_v21, %s3776_s15  ;;  %v3687_v3 = vpop.eup %3686  ;;  %v673_v59 = vadd.f32 1.0, %v3685_v57  ;;  %3694 = vrcp.f32 %v676_v2 }
 0x123   : > { %v3689_v8 = vpop.eup %3688  ;;  %v674_v37 = vadd.f32 1.0, %v3687_v3  ;;  %v4047_v17 = vadd.f32 %v750_v6, %v714_v5 }
 0x124   : > { %v3691_v56 = vpop.eup %3690  ;;  %v716_v30 = vmul.f32 %v3689_v8, %v3937_v41  ;;  %3696 = vrcp.f32 %v673_v59 }
 0x125   : > { %v718_v19 = vmul.f32 %v3691_v56, %v3940_v44  ;;  %3698 = vrcp.f32 %v674_v37  ;;  %v2970_v48 = vpack.i.bf16 %v4044_v22, %v4047_v17 }
 0x126   : > { %2936 = vrot.lane.b32.xlu0 %v4021_v47, %s3774_s13  ;;  %2951 = vrot.lane.b32.xlu1 %v2950_v53, %s3775_s14  ;;  %v4054_v20 = vadd.f32 %v758_v16, %v716_v30 }
 0x127   : > { %v4059_v4 = vadd.f32 %v3954_v61, %v718_v19 }
 0x129   : > { %5644 = vst [vmem:[#allocation6_spill] sm:$0xff] %v4059_v4  ;;  %v2975_v44 = vpack.i.bf16 %v4059_v4, %v4054_v20 }
 0x12a   : > { %2941 = vrot.lane.b32.xlu0 %v4021_v47, %s3776_s15  ;;  %2956 = vrot.lane.b32.xlu1 %v2950_v53, %s3774_s13 }
 0x12b   : > { %v3693_v41 = vpop.eup %3692 }
 0x12c   : > { %v3695_v25 = vpop.eup %3694  ;;  %v723_v28 = vmul.f32 %v3693_v41, %v3963_v12 }
 0x12d   : > { %v724_v29 = vmul.f32 %v3695_v25, %v3970_v14 }
 0x12e   : > { %2946 = vrot.lane.b32.xlu0 %v4021_v47, %s3777_s16  ;;  %2961 = vrot.lane.b32.xlu1 %v2950_v53, %s3776_s15  ;;  %v3697_v27 = vpop.eup %3696  ;;  %v4072_v32 = vadd.f32 %v754_v62, %v723_v28 }
 0x12f   : > { %v3699_v61 = vpop.eup %3698  ;;  %v721_v31 = vmul.f32 %v3697_v27, %v3980_v23  ;;  %v4075_v24 = vadd.f32 %v758_v16, %v724_v29 }
 0x130   : > { %v722_v1 = vmul.f32 %v3699_v61, %v3986_v26 }
 0x131   : > { %v4080_v12 = vadd.f32 %v4007_v11, %v721_v31  ;;  %v3015_v33 = vpack.i.bf16 %v4075_v24, %v4072_v32 }
 0x132   : > { %2971 = vrot.lane.b32.xlu0 %v2970_v48, %s3775_s14  ;;  %2966 = vrot.lane.b32.xlu1 %v2950_v53, %s3777_s16  ;;  %v4082_v14 = vadd.f32 %v750_v6, %v722_v1 }
 0x134   : > { %v4090_v23 = vpack.i.bf16 %v4082_v14, %v4080_v12 }
 0x136   : > { %2981 = vrot.lane.b32.xlu0 %v2970_v48, %s3774_s13  ;;  %2976 = vrot.lane.b32.xlu1 %v2975_v44, %s3775_s14  ;;  %5645 = vst [vmem:[#allocation7_spill] sm:$0xff] %v4090_v23 }
 0x13a   : > { %2991 = vrot.lane.b32.xlu0 %v2970_v48, %s3776_s15  ;;  %2986 = vrot.lane.b32.xlu1 %v2975_v44, %s3774_s13 }
 0x13e   : > { %3001 = vrot.lane.b32.xlu0 %v2970_v48, %s3777_s16  ;;  %2996 = vrot.lane.b32.xlu1 %v2975_v44, %s3776_s15 }
 0x142   : > { %3016 = vrot.lane.b32.xlu0 %v3015_v33, %s3775_s14  ;;  %3006 = vrot.lane.b32.xlu1 %v2975_v44, %s3777_s16 }
 0x146   : > { %3026 = vrot.lane.b32.xlu0 %v3015_v33, %s3774_s13  ;;  %3011 = vrot.lane.b32.xlu1 %v4090_v23, %s3775_s14 }
 0x14a   : > { %3036 = vrot.lane.b32.xlu0 %v3015_v33, %s3776_s15  ;;  %3021 = vrot.lane.b32.xlu1 %v4090_v23, %s3774_s13 }
 0x14e   : > { %3046 = vrot.lane.b32.xlu0 %v3015_v33, %s3777_s16  ;;  %3031 = vrot.lane.b32.xlu1 %v4090_v23, %s3776_s15 }
 0x152   : > { %3041 = vrot.lane.b32.xlu1 %v4090_v23, %s3777_s16 }
 0x156   : > { %3051 = vrot.lane.b32.xlu1 %v3993_v21, %s3777_s16 }
 0x188   : > { %v4105_v26 = vpop.permute.xlu0 %2901  ;;  %v4107_v34 = vpop.permute.xlu1 %2896 }
 0x189   : > { %v2899_v43 = vunpack.i.h.bf16 %v4107_v34  ;;  %v5621_v21 = vunpack.i.l.bf16 %v4107_v34  ;;  %v2904_v51 = vunpack.i.h.bf16 %v4105_v26  ;;  %v5620_v52 = vunpack.i.l.bf16 %v4105_v26 }
 0x18b   : > { %v833_v9 = vsel %vm831_vm1, %v5621_v21, %v2899_v43  ;;  %v912_v2 = vsel %vm910_vm2, %v5620_v52, %v2904_v51 }
 0x18c   : > { %v4109_v35 = vpop.permute.xlu0 %2906  ;;  %v4111_v36 = vpop.permute.xlu1 %2916  ;;  %v863_v57 = vmax.f32 %v3966_v13, %v833_v9 }
 0x18d   : > { %v2909_v58 = vunpack.i.h.bf16 %v4109_v35  ;;  %v5616_v62 = vunpack.i.l.bf16 %v4109_v35 }
 0x18e   : > { %v942_v16 = vmax.f32 %v863_v57, %v912_v2 }
 0x18f   : > { %v991_v30 = vsel %vm989_vm3, %v5616_v62, %v2909_v58 }
 0x190   : > { %v4113_v7 = vpop.permute.xlu0 %2911  ;;  %v4115_v11 = vpop.permute.xlu1 %2921  ;;  %v1021_v28 = vmax.f32 %v942_v16, %v991_v30 }
 0x191   : > { %v2914_v6 = vunpack.i.h.bf16 %v4113_v7  ;;  %v5607_v8 = vunpack.i.l.bf16 %v4113_v7 }
 0x193   : > { %v1070_v25 = vsel %vm1068_vm4, %v5607_v8, %v2914_v6 }
 0x194   : > { %v4117_v39 = vpop.permute.xlu0 %2931  ;;  %v4119_v42 = vpop.permute.xlu1 %2926  ;;  %v4175_v31 = vmax.f32 %v1021_v28, %v1070_v25 }
 0x195   : > { %v2933_v30 = vunpack.i.l.bf16 %v4117_v39 }
 0x198   : > { %v4123_v45 = vpop.permute.xlu0 %2936  ;;  %v4125_v15 = vpop.permute.xlu1 %2951 }
 0x199   : > { %v5617_v50 = vunpack.i.l.bf16 %v4125_v15 }
 0x19b   : > { %v834_v63 = vsel %vm831_vm1, %v2899_v43, %v5617_v50 }
 0x19c   : > { %v4133_v53 = vpop.permute.xlu0 %2941  ;;  %v4135_v54 = vpop.permute.xlu1 %2956  ;;  %v864_v37 = vmax.f32 %v3960_v10, %v834_v63 }
 0x19d   : > { %v5612_v55 = vunpack.i.l.bf16 %v4135_v54 }
 0x19f   : > { %v913_v59 = vsel %vm910_vm2, %v2904_v51, %v5612_v55 }
 0x1a0   : > { %v4147_v3 = vpop.permute.xlu0 %2946  ;;  %v4149_v5 = vpop.permute.xlu1 %2961  ;;  %v943_v48 = vmax.f32 %v864_v37, %v913_v59  ;;  %v5614_v37 = vunpack.i.h.bf16 %v4117_v39 }
 0x1a1   : > { %v5611_v56 = vunpack.i.l.bf16 %v4149_v5 }
 0x1a2   : > { %v841_v8 = vsel %vm831_vm1, %v2933_v30, %v5614_v37  ;;  %v2948_v37 = vunpack.i.l.bf16 %v4147_v3 }
 0x1a3   : > { %v992_v19 = vsel %vm989_vm3, %v2909_v58, %v5611_v56 }
 0x1a4   : > { %v4164_v41 = vpop.permute.xlu0 %2971  ;;  %v4166_v44 = vpop.permute.xlu1 %2966  ;;  %v1022_v29 = vmax.f32 %v943_v48, %v992_v19  ;;  %v5615_v19 = vunpack.i.h.bf16 %v4123_v45  ;;  %v2938_v48 = vunpack.i.l.bf16 %v4123_v45 }
 0x1a5   : > { %v5610_v27 = vunpack.i.l.bf16 %v4166_v44 }
 0x1a7   : > { %v1071_v61 = vsel %vm1068_vm4, %v2914_v6, %v5610_v27 }
 0x1a8   : > { %v4177_v1 = vmax.f32 %v1022_v29, %v1071_v61  ;;  %v4179_v33 = vpop.permute.xlu0 %2981  ;;  %v4181_v43 = vpop.permute.xlu1 %2976 }
 0x1a9   : > { %v5609_v51 = vunpack.i.l.bf16 %v4181_v43  ;;  %v5613_v2 = vunpack.i.h.bf16 %v4181_v43 }
 0x1aa   : > { %v3060_v9 = vpack.i.bf16 %v4177_v1, %v4175_v31 }
 0x1ab   : > { %v869_v6 = vmax.f32 %v4054_v20, %v5609_v51  ;;  %v840_v29 = vsel %vm831_vm1, %v5613_v2, %v2933_v30  ;;  %v2943_v51 = vunpack.i.l.bf16 %v4133_v53 }
 0x1ac   : > { %v4186_v57 = vpop.permute.xlu0 %2991  ;;  %v4188_v58 = vpop.permute.xlu1 %2986  ;;  %3061 = vrot.lane.b32.xlu1 %v3060_v9, %s3778_s17  ;;  %3056 = vrot.lane.b32.xlu0 %v3060_v9, %s3779_s18  ;;  %v871_v55 = vmax.f32 %v4059_v4, %v840_v29  ;;  %v2918_v29 = vunpack.i.l.bf16 %v4111_v36 }
 0x1ad   : > { %v5608_v63 = vunpack.i.l.bf16 %v4188_v58  ;;  %v5618_v25 = vunpack.i.h.bf16 %v4188_v58 }
 0x1af   : > { %v948_v20 = vmax.f32 %v869_v6, %v5608_v63  ;;  %v920_v6 = vsel %vm910_vm2, %v2938_v48, %v5615_v19  ;;  %v5624_v63 = vunpack.i.h.bf16 %v4133_v53  ;;  %v919_v27 = vsel %vm910_vm2, %v5618_v25, %v2938_v48 }
 0x1b0   : > { %v4197_v59 = vpop.permute.xlu0 %3001  ;;  %v4199_v16 = vpop.permute.xlu1 %2996  ;;  %3066 = vrot.lane.b32.xlu0 %v3060_v9, %s3780_s19 }
 0x1b1   : > { %v5619_v28 = vunpack.i.l.bf16 %v4199_v16  ;;  %v5622_v61 = vunpack.i.h.bf16 %v4199_v16  ;;  %v999_v21 = vsel %vm989_vm3, %v2943_v51, %v5624_v63 }
 0x1b3   : > { %v1027_v2 = vmax.f32 %v948_v20, %v5619_v28  ;;  %v998_v19 = vsel %vm989_vm3, %v5622_v61, %v2943_v51  ;;  %v872_v20 = vmax.f32 %v4004_v38, %v841_v8  ;;  %v950_v28 = vmax.f32 %v871_v55, %v919_v27 }
 0x1b4   : > { %v4214_v0 = vpop.permute.xlu0 %3016  ;;  %v4216_v9 = vpop.permute.xlu1 %3006  ;;  %v2923_v38 = vunpack.i.l.bf16 %v4115_v11  ;;  %v5646_v27 = vunpack.i.h.bf16 %v4147_v3 }
 0x1b5   : > { %v5625_v30 = vunpack.i.h.bf16 %v4214_v0  ;;  %v5626_v62 = vunpack.i.h.bf16 %v4216_v9  ;;  %v5627_v50 = vunpack.i.l.bf16 %v4216_v9  ;;  %v951_v55 = vmax.f32 %v872_v20, %v920_v6 }
 0x1b6   : > { %v1029_v8 = vmax.f32 %v950_v28, %v998_v19  ;;  %v1078_v51 = vsel %vm1068_vm4, %v2948_v37, %v5646_v27  ;;  %v2954_v28 = vunpack.i.h.bf16 %v4125_v15  ;;  %v2929_v27 = vunpack.i.h.bf16 %v4119_v42 }
 0x1b7   : > { %v877_v61 = vmax.f32 %v4075_v24, %v5625_v30  ;;  %v1077_v56 = vsel %vm1068_vm4, %v5626_v62, %v2948_v37  ;;  %v4258_v4 = vmax.f32 %v1027_v2, %v5627_v50  ;;  %v5647_v62 = vunpack.i.l.bf16 %v4107_v34 }
 0x1b8   : > { %v4240_v48 = vpop.permute.xlu0 %3026  ;;  %v4242_v25 = vpop.permute.xlu1 %3011  ;;  %v1030_v50 = vmax.f32 %v951_v55, %v999_v21  ;;  %v4273_v13 = vmax.f32 %v1029_v8, %v1077_v56  ;;  %v5648_v37 = vunpack.i.l.bf16 %v4105_v26  ;;  %v2959_v21 = vunpack.i.h.bf16 %v4135_v54 }
 0x1b9   : > { %v5630_v52 = vunpack.i.h.bf16 %v4240_v48  ;;  %v832_v2 = vsel %vm831_vm1, %v2918_v29, %v5647_v62  ;;  %v2919_v55 = vunpack.i.h.bf16 %v4111_v36  ;;  %v5649_v8 = vunpack.i.l.bf16 %v4125_v15 }
 0x1ba   : > { %v911_v6 = vsel %vm910_vm2, %v2923_v38, %v5648_v37  ;;  %v4281_v20 = vmax.f32 %v1030_v50, %v1078_v51  ;;  %v862_v62 = vmax.f32 %v3972_v60, %v832_v2  ;;  %v2924_v50 = vunpack.i.h.bf16 %v4115_v11 }
 0x1bb   : > { %v956_v63 = vmax.f32 %v877_v61, %v5630_v52  ;;  %v2928_v61 = vunpack.i.l.bf16 %v4119_v42  ;;  %v5650_v51 = vunpack.i.l.bf16 %v4109_v35  ;;  %v2964_v36 = vunpack.i.h.bf16 %v4149_v5 }
 0x1bc   : > { %v4266_v24 = vpop.permute.xlu0 %3036  ;;  %v4268_v30 = vpop.permute.xlu1 %3021  ;;  %v4294_v26 = vpack.i.bf16 %v4281_v20, %v4273_v13  ;;  %v941_v38 = vmax.f32 %v862_v62, %v911_v6  ;;  %v5651_v37 = vunpack.i.h.bf16 %v4181_v43  ;;  %v5652_v11 = vunpack.i.l.bf16 %v4135_v54 }
 0x1bd   : > { %v5629_v19 = vunpack.i.h.bf16 %v4266_v24  ;;  %v990_v2 = vsel %vm989_vm3, %v2928_v61, %v5650_v51  ;;  %v2974_v6 = vunpack.i.h.bf16 %v4164_v41  ;;  %v2973_v42 = vunpack.i.l.bf16 %v4164_v41 }
 0x1be   : > { %3071 = vrot.lane.b32.xlu1 %v4294_v26, %s3779_s18  ;;  %v914_v15 = vsel %vm910_vm2, %v5652_v11, %v2959_v21  ;;  %v5653_v54 = vunpack.i.h.bf16 %v4188_v58  ;;  %v5654_v52 = vunpack.i.l.bf16 %v4149_v5 }
 0x1bf   : > { %v1035_v34 = vmax.f32 %v956_v63, %v5629_v19  ;;  %v835_v63 = vsel %vm831_vm1, %v5649_v8, %v2954_v28  ;;  %v839_v19 = vsel %vm831_vm1, %v2919_v55, %v5651_v37  ;;  %v2969_v55 = vunpack.i.h.bf16 %v4166_v44 }
 0x1c0   : > { %v4287_v56 = vpop.permute.xlu0 %3046  ;;  %v4289_v29 = vpop.permute.xlu1 %3031  ;;  %v865_v62 = vmax.f32 %v4023_v49, %v835_v63  ;;  %v2983_v8 = vunpack.i.l.bf16 %v4179_v33  ;;  %v918_v51 = vsel %vm910_vm2, %v2924_v50, %v5653_v54  ;;  %v1020_v37 = vmax.f32 %v941_v38, %v990_v2 }
 0x1c1   : > { %v5631_v60 = vunpack.i.h.bf16 %v4287_v56  ;;  %v870_v11 = vmax.f32 %v3974_v18, %v839_v19  ;;  %v5655_v63 = vunpack.i.h.bf16 %v4199_v16  ;;  %v836_v23 = vsel %vm831_vm1, %v2954_v28, %v2973_v42 }
 0x1c2   : > { %v944_v41 = vmax.f32 %v865_v62, %v914_v15  ;;  %v837_v49 = vsel %vm831_vm1, %v2973_v42, %v2974_v6  ;;  %v2993_v50 = vunpack.i.l.bf16 %v4186_v57  ;;  %v5656_v18 = vunpack.i.l.bf16 %v4166_v44 }
 0x1c3   : > { %v4318_v35 = vmax.f32 %v1035_v34, %v5631_v60  ;;  %v993_v34 = vsel %vm989_vm3, %v5654_v52, %v2964_v36  ;;  %v2984_v60 = vunpack.i.h.bf16 %v4179_v33  ;;  %v997_v47 = vsel %vm989_vm3, %v2929_v27, %v5655_v63 }
 0x1c4   : > { %v4320_v61 = vpop.permute.xlu1 %3041  ;;  %v949_v38 = vmax.f32 %v870_v11, %v918_v51  ;;  %v1072_v5 = vsel %vm1068_vm4, %v5656_v18, %v2969_v55  ;;  %v915_v52 = vsel %vm910_vm2, %v2959_v21, %v2983_v8  ;;  %v5657_v33 = vunpack.i.l.bf16 %v4181_v43 }
 0x1c5   : > { %v2994_v27 = vunpack.i.h.bf16 %v4186_v57  ;;  %v3003_v28 = vunpack.i.l.bf16 %v4197_v59  ;;  %v866_v54 = vmax.f32 %v4017_v46, %v836_v23  ;;  %v867_v51 = vmax.f32 %v4047_v17, %v837_v49 }
 0x1c6   : > { %v838_v19 = vsel %vm831_vm1, %v2974_v6, %v5657_v33  ;;  %v1028_v42 = vmax.f32 %v949_v38, %v997_v47  ;;  %v916_v44 = vsel %vm910_vm2, %v2983_v8, %v2984_v60  ;;  %v5658_v11 = vunpack.i.h.bf16 %v4216_v9 }
 0x1c7   : > { %v994_v43 = vsel %vm989_vm3, %v2964_v36, %v2993_v50  ;;  %v5659_v6 = vunpack.i.l.bf16 %v4188_v58  ;;  %v5660_v63 = vunpack.i.l.bf16 %v4113_v7  ;;  %v945_v23 = vmax.f32 %v866_v54, %v915_v52 }
 0x1c8   : > { %v3052_v2 = vpop.permute.xlu1 %3051  ;;  %v868_v49 = vmax.f32 %v4044_v22, %v838_v19  ;;  %v3004_v8 = vunpack.i.h.bf16 %v4197_v59  ;;  %v995_v18 = vsel %vm989_vm3, %v2993_v50, %v2994_v27  ;;  %v1073_v36 = vsel %vm1068_vm4, %v2969_v55, %v3003_v28 }
 0x1c9   : > { %v3054_v15 = vunpack.i.h.bf16 %v3052_v2  ;;  %v3053_v62 = vunpack.i.l.bf16 %v3052_v2  ;;  %v917_v57 = vsel %vm910_vm2, %v2984_v60, %v5659_v6  ;;  %v5661_v58 = vunpack.i.l.bf16 %v4199_v16 }
 0x1ca   : > { %v3018_v7 = vunpack.i.l.bf16 %v4214_v0  ;;  %v1024_v33 = vmax.f32 %v945_v23, %v994_v43  ;;  %v1023_v22 = vmax.f32 %v944_v41, %v993_v34  ;;  %v946_v59 = vmax.f32 %v867_v51, %v916_v44 }
 0x1cb   : > { %v1076_v21 = vsel %vm1068_vm4, %v3054_v15, %v5658_v11  ;;  %v1069_v47 = vsel %vm1068_vm4, %v3053_v62, %v5660_v63  ;;  %v996_v60 = vsel %vm989_vm3, %v2994_v27, %v5661_v58  ;;  %v947_v15 = vmax.f32 %v868_v49, %v917_v57 }
 0x1cc   : > { %v4361_v38 = vmax.f32 %v1028_v42, %v1076_v21  ;;  %v4365_v2 = vmax.f32 %v1020_v37, %v1069_v47  ;;  %v5662_v37 = vunpack.i.l.bf16 %v4216_v9  ;;  %v3014_v55 = vunpack.i.h.bf16 %v4242_v25 }
 0x1cd   : > { %v1074_v16 = vsel %vm1068_vm4, %v3003_v28, %v3004_v8  ;;  %v4382_v19 = vmax.f32 %v1024_v33, %v1073_v36  ;;  %v1026_v27 = vmax.f32 %v947_v15, %v996_v60  ;;  %v3028_v42 = vunpack.i.l.bf16 %v4240_v48 }
 0x1ce   : > { %v4375_v52 = vpack.i.bf16 %v4361_v38, %v4365_v2  ;;  %v1075_v50 = vsel %vm1068_vm4, %v3004_v8, %v5662_v37  ;;  %v4389_v41 = vmax.f32 %v1023_v22, %v1072_v5  ;;  %v1025_v9 = vmax.f32 %v946_v59, %v995_v18 }
 0x1cf   : > { %v5663_v34 = vunpack.i.h.bf16 %v4214_v0  ;;  %v3013_v28 = vunpack.i.l.bf16 %v4242_v25  ;;  %v4395_v54 = vmax.f32 %v1026_v27, %v1075_v50  ;;  %v3024_v51 = vunpack.i.h.bf16 %v4268_v30 }
 0x1d0   : > { %3086 = vrot.lane.b32.xlu1 %v4375_v52, %s3778_s17  ;;  %3076 = vrot.lane.b32.xlu0 %v4375_v52, %s3779_s18  ;;  %v4398_v44 = vmax.f32 %v1025_v9, %v1074_v16  ;;  %v844_v11 = vsel %vm831_vm1, %v3014_v55, %v3018_v7  ;;  %v3023_v21 = vunpack.i.l.bf16 %v4268_v30  ;;  %v5664_v43 = vunpack.i.h.bf16 %v4240_v48 }
 0x1d1   : > { %v845_v62 = vsel %vm831_vm1, %v3018_v7, %v5663_v34  ;;  %v3038_v6 = vunpack.i.l.bf16 %v4266_v24  ;;  %v3095_v25 = vpack.i.bf16 %v4382_v19, %v4389_v41  ;;  %v5665_v57 = vunpack.i.h.bf16 %v4117_v39 }
 0x1d2   : > { %v876_v5 = vmax.f32 %v4072_v32, %v845_v62  ;;  %v924_v0 = vsel %vm910_vm2, %v3028_v42, %v5664_v43  ;;  %v843_v32 = vsel %vm831_vm1, %v3013_v28, %v3014_v55  ;;  %v3034_v48 = vunpack.i.h.bf16 %v4289_v29 }
 0x1d3   : > { %v842_v30 = vsel %vm831_vm1, %v5665_v57, %v3013_v28  ;;  %v3033_v63 = vunpack.i.l.bf16 %v4289_v29  ;;  %v875_v47 = vmax.f32 %v4082_v14, %v844_v11  ;;  %v923_v23 = vsel %vm910_vm2, %v3024_v51, %v3028_v42 }
 0x1d4   : > { %3091 = vrot.lane.b32.xlu1 %v4294_v26, %s3780_s19  ;;  %3081 = vrot.lane.b32.xlu0 %v4294_v26, %s3778_s17  ;;  %v3100_v26 = vpack.i.bf16 %v4395_v54, %v4398_v44  ;;  %v5666_v49 = vunpack.i.h.bf16 %v4123_v45  ;;  %v922_v39 = vsel %vm910_vm2, %v3023_v21, %v3024_v51  ;;  %v3044_v18 = vunpack.i.h.bf16 %v4320_v61 }
 0x1d5   : > { %v3043_v36 = vunpack.i.l.bf16 %v4320_v61  ;;  %v873_v58 = vmax.f32 %v4009_v40, %v842_v30  ;;  %v874_v29 = vmax.f32 %v4080_v12, %v843_v32  ;;  %v5667_v14 = vunpack.i.h.bf16 %v4266_v24 }
 0x1d6   : > { %v921_v8 = vsel %vm910_vm2, %v5666_v49, %v3023_v21  ;;  %v3048_v45 = vunpack.i.l.bf16 %v4287_v56  ;;  %v1002_v7 = vsel %vm989_vm3, %v3034_v48, %v3038_v6  ;;  %v5668_v33 = vunpack.i.h.bf16 %v4133_v53 }
 0x1d7   : > { %v1003_v60 = vsel %vm989_vm3, %v3038_v6, %v5667_v14  ;;  %v1001_v40 = vsel %vm989_vm3, %v3033_v63, %v3034_v48  ;;  %v952_v15 = vmax.f32 %v873_v58, %v921_v8  ;;  %v953_v12 = vmax.f32 %v874_v29, %v922_v39 }
 0x1d8   : > { %3096 = vrot.lane.b32.xlu1 %v3095_v25, %s3779_s18  ;;  %3101 = vrot.lane.b32.xlu0 %v3100_v26, %s3779_s18  ;;  %v1000_v61 = vsel %vm989_vm3, %v5668_v33, %v3033_v63  ;;  %v954_v22 = vmax.f32 %v875_v47, %v923_v23  ;;  %v955_v24 = vmax.f32 %v876_v5, %v924_v0  ;;  %v5669_v37 = vunpack.i.h.bf16 %v4147_v3 }
 0x1d9   : > { %v1081_v59 = vsel %vm1068_vm4, %v3044_v18, %v3048_v45  ;;  %v1080_v55 = vsel %vm1068_vm4, %v3043_v36, %v3044_v18  ;;  %v1031_v16 = vmax.f32 %v952_v15, %v1000_v61  ;;  %v1032_v27 = vmax.f32 %v953_v12, %v1001_v40 }
 0x1da   : > { %v1079_v50 = vsel %vm1068_vm4, %v5669_v37, %v3043_v36  ;;  %v1033_v42 = vmax.f32 %v954_v22, %v1002_v7  ;;  %v1034_v53 = vmax.f32 %v955_v24, %v1003_v60  ;;  %v5670_v9 = vunpack.i.h.bf16 %v4287_v56 }
 0x1db   : > { %v4452_v62 = vmax.f32 %v1031_v16, %v1079_v50  ;;  %v4454_v28 = vmax.f32 %v1032_v27, %v1080_v55 }
 0x1dc   : > { %3111 = vrot.lane.b32.xlu1 %v3100_v26, %s3778_s17  ;;  %3106 = vrot.lane.b32.xlu0 %v3095_v25, %s3778_s17  ;;  %v1082_v34 = vsel %vm1068_vm4, %v3048_v45, %v5670_v9  ;;  %v4456_v3 = vmax.f32 %v1033_v42, %v1081_v59 }
 0x1dd   : > { %v4458_v51 = vmax.f32 %v1034_v53, %v1082_v34  ;;  %v3125_v56 = vpack.i.bf16 %v4454_v28, %v4452_v62 }
 0x1df   : > { %v3130_v11 = vpack.i.bf16 %v4458_v51, %v4456_v3 }
 0x1e0   : > { %3116 = vrot.lane.b32.xlu1 %v3095_v25, %s3780_s19  ;;  %3121 = vrot.lane.b32.xlu0 %v3100_v26, %s3780_s19 }
 0x1e4   : > { %3131 = vrot.lane.b32.xlu1 %v3130_v11, %s3779_s18  ;;  %3126 = vrot.lane.b32.xlu0 %v3125_v56, %s3779_s18 }
 0x1e8   : > { %3136 = vrot.lane.b32.xlu1 %v3125_v56, %s3778_s17  ;;  %3141 = vrot.lane.b32.xlu0 %v3130_v11, %s3778_s17 }
 0x1ec   : > { %3151 = vrot.lane.b32.xlu1 %v3130_v11, %s3780_s19  ;;  %3146 = vrot.lane.b32.xlu0 %v3125_v56, %s3780_s19 }
 0x1f0   : > { %3156 = vrot.lane.b32.xlu0 %v4375_v52, %s3780_s19 }
 0x21e   : > { %v3057_v21 = vpop.permute.xlu0 %3056  ;;  %v3062_v5 = vpop.permute.xlu1 %3061 }
 0x21f   : > { %v3059_v23 = vunpack.i.h.bf16 %v3057_v21  ;;  %v3058_v26 = vunpack.i.l.bf16 %v3057_v21  ;;  %v3064_v36 = vunpack.i.h.bf16 %v3062_v5  ;;  %v3063_v58 = vunpack.i.l.bf16 %v3062_v5 }
 0x221   : > { %v1159_v18 = vsel %vm1157_vm5, %v3058_v26, %v3059_v23  ;;  %v1228_v59 = vsel %vm1226_vm6, %v3063_v58, %v3064_v36 }
 0x222   : > { %v4474_v43 = vpop.permute.xlu0 %3066  ;;  %v1185_v45 = vmax.f32 %v4175_v31, %v1159_v18 }
 0x223   : > { %v3069_v7 = vunpack.i.h.bf16 %v4474_v43  ;;  %v3068_v33 = vunpack.i.l.bf16 %v4474_v43 }
 0x224   : > { %v1254_v42 = vmax.f32 %v1185_v45, %v1228_v59 }
 0x225   : > { %v1296_v34 = vsel %vm298_vm0, %v3068_v33, %v3069_v7 }
 0x230   : > { %v4476_v0 = vpop.permute.xlu1 %3071 }
 0x231   : > { %v3073_v15 = vunpack.i.l.bf16 %v4476_v0 }
 0x242   : > { %v3077_v6 = vpop.permute.xlu0 %3076  ;;  %v3087_v25 = vpop.permute.xlu1 %3086 }
 0x243   : > { %v3078_v8 = vunpack.i.l.bf16 %v3077_v6  ;;  %v3079_v29 = vunpack.i.h.bf16 %v3077_v6  ;;  %v3088_v12 = vunpack.i.l.bf16 %v3087_v25  ;;  %v3089_v50 = vunpack.i.h.bf16 %v3087_v25 }
 0x245   : > { %v1158_v14 = vsel %vm1157_vm5, %v3078_v8, %v3058_v26  ;;  %v1164_v55 = vsel %vm1157_vm5, %v3079_v29, %v3073_v15  ;;  %v1227_v11 = vsel %vm1226_vm6, %v3088_v12, %v3063_v58 }
 0x246   : > { %v4478_v57 = vpop.permute.xlu0 %3081  ;;  %v4482_v32 = vpop.permute.xlu1 %3091  ;;  %v1184_v37 = vmax.f32 %v4365_v2, %v1158_v14  ;;  %v1191_v21 = vmax.f32 %v4361_v38, %v1164_v55 }
 0x247   : > { %v3083_v22 = vunpack.i.l.bf16 %v4478_v57  ;;  %v3093_v5 = vunpack.i.l.bf16 %v4482_v32 }
 0x248   : > { %v1253_v6 = vmax.f32 %v1184_v37, %v1227_v11  ;;  %v1322_v37 = vmax.f32 %v1254_v42, %v1296_v34 }
 0x249   : > { %v1233_v56 = vsel %vm1226_vm6, %v3089_v50, %v3083_v22 }
 0x24a   : > { %v4480_v30 = vpop.permute.xlu0 %3101  ;;  %v3097_v63 = vpop.permute.xlu1 %3096  ;;  %v1260_v8 = vmax.f32 %v1191_v21, %v1233_v56 }
 0x24b   : > { %v3098_v60 = vunpack.i.l.bf16 %v3097_v63  ;;  %v3099_v53 = vunpack.i.h.bf16 %v3097_v63  ;;  %v3103_v25 = vunpack.i.l.bf16 %v4480_v30  ;;  %v3104_v58 = vunpack.i.h.bf16 %v4480_v30 }
 0x24d   : > { %v1160_v16 = vsel %vm1157_vm5, %v3059_v23, %v3098_v60  ;;  %v1161_v18 = vsel %vm1157_vm5, %v3098_v60, %v3099_v53  ;;  %v1162_v50 = vsel %vm1157_vm5, %v3099_v53, %v3103_v25 }
 0x24e   : > { %v4484_v48 = vpop.permute.xlu0 %3106  ;;  %v4490_v49 = vpop.permute.xlu1 %3111  ;;  %v1186_v43 = vmax.f32 %v4177_v1, %v1160_v16  ;;  %v1187_v55 = vmax.f32 %v4389_v41, %v1161_v18  ;;  %v1188_v53 = vmax.f32 %v4382_v19, %v1162_v50 }
 0x24f   : > { %v3108_v24 = vunpack.i.l.bf16 %v4484_v48  ;;  %v3109_v38 = vunpack.i.h.bf16 %v4484_v48  ;;  %v3114_v16 = vunpack.i.h.bf16 %v4490_v49 }
 0x251   : > { %v1229_v2 = vsel %vm1226_vm6, %v3064_v36, %v3108_v24  ;;  %v3113_v36 = vunpack.i.l.bf16 %v4490_v49  ;;  %v1230_v42 = vsel %vm1226_vm6, %v3108_v24, %v3109_v38  ;;  %v4552_v49 = vmax.f32 %v1322_v37, %v4177_v1 }
 0x252   : > { %v4486_v47 = vpop.permute.xlu0 %3121  ;;  %v3117_v61 = vpop.permute.xlu1 %3116  ;;  %v1255_v29 = vmax.f32 %v1186_v43, %v1229_v2  ;;  %v1256_v21 = vmax.f32 %v1187_v55, %v1230_v42 }
 0x253   : > { %v3118_v27 = vunpack.i.l.bf16 %v3117_v61  ;;  %v3119_v60 = vunpack.i.h.bf16 %v3117_v61  ;;  %v3123_v30 = vunpack.i.l.bf16 %v4486_v47  ;;  %v1231_v11 = vsel %vm1226_vm6, %v3109_v38, %v3113_v36 }
 0x254   : > { %v3124_v61 = vunpack.i.h.bf16 %v4486_v47  ;;  %v1232_v24 = vsel %vm1226_vm6, %v3113_v36, %v3114_v16  ;;  %v1257_v47 = vmax.f32 %v1188_v53, %v1231_v11 }
 0x255   : > { %v1297_v63 = vsel %vm298_vm0, %v3069_v7, %v3118_v27  ;;  %v1298_v56 = vsel %vm298_vm0, %v3118_v27, %v3119_v60  ;;  %v1299_v2 = vsel %vm298_vm0, %v3119_v60, %v3123_v30 }
 0x256   : > { %v4488_v52 = vpop.permute.xlu0 %3126  ;;  %v1323_v12 = vmax.f32 %v1255_v29, %v1297_v63  ;;  %v3132_v43 = vpop.permute.xlu1 %3131  ;;  %v1324_v27 = vmax.f32 %v1256_v21, %v1298_v56 }
 0x258   : > { %v4545_v34 = vmax.f32 %v1323_v12, %v4389_v41  ;;  %v1190_v41 = vmax.f32 %v4395_v54, %v3104_v58  ;;  %v4571_v29 = vmax.f32 %v1324_v27, %v4382_v19  ;;  %v3084_v12 = vunpack.i.h.bf16 %v4478_v57 }
 0x259   : > { %v3129_v57 = vunpack.i.h.bf16 %v4488_v52 }
 0x25a   : > { %v4492_v39 = vpop.permute.xlu0 %3141  ;;  %v3180_v63 = vpack.i.bf16 %v4545_v34, %v4552_v49  ;;  %v3137_v38 = vpop.permute.xlu1 %3136 }
 0x25e   : > { %v4499_v40 = vpop.permute.xlu0 %3146  ;;  %v3152_v42 = vpop.permute.xlu1 %3151 }
 0x25f   : > { %v3148_v50 = vunpack.i.l.bf16 %v4499_v40  ;;  %v3153_v21 = vunpack.i.l.bf16 %v3152_v42 }
 0x262   : > { %v3157_v9 = vpop.permute.xlu0 %3156 }
 0x263   : > { %v3159_v23 = vunpack.i.h.bf16 %v3157_v9  ;;  %v3158_v26 = vunpack.i.l.bf16 %v3157_v9 }
 0x265   : > { %v1301_v14 = vsel %vm298_vm0, %v3159_v23, %v3093_v5  ;;  %v1295_v45 = vsel %vm298_vm0, %v3158_v26, %v3068_v33  ;;  %v1163_v33 = vsel %vm1157_vm5, %v3103_v25, %v3104_v58  ;;  %v1325_v25 = vmax.f32 %v1257_v47, %v1299_v2 }
 0x266   : > { %v1321_v7 = vmax.f32 %v1253_v6, %v1295_v45  ;;  %v1328_v59 = vmax.f32 %v1260_v8, %v1301_v14  ;;  %v1189_v1 = vmax.f32 %v4398_v44, %v1163_v33  ;;  %v1300_v6 = vsel %vm298_vm0, %v3123_v30, %v3124_v61 }
 0x267   : > { %v1259_v26 = vmax.f32 %v1190_v41, %v3114_v16  ;;  %v3074_v8 = vunpack.i.h.bf16 %v4476_v0  ;;  %v4574_v36 = vmax.f32 %v1325_v25, %v4398_v44  ;;  %v3128_v14 = vunpack.i.l.bf16 %v4488_v52 }
 0x268   : > { %v4534_v48 = vmax.f32 %v1321_v7, %v4175_v31  ;;  %v4537_v9 = vmax.f32 %v1328_v59, %v4273_v13  ;;  %v1258_v23 = vmax.f32 %v1189_v1, %v1232_v24  ;;  %v3138_v7 = vunpack.i.l.bf16 %v3137_v38 }
 0x269   : > { %v1327_v58 = vmax.f32 %v1259_v26, %v3124_v61  ;;  %v1165_v45 = vsel %vm1157_vm5, %v3073_v15, %v3074_v8  ;;  %v3195_v59 = vpack.i.bf16 %v4574_v36, %v4571_v29  ;;  %v1166_v37 = vsel %vm1157_vm5, %v3074_v8, %v3128_v14 }
 0x26a   : > { %v4549_v31 = vpack.i.bf16 %v4537_v9, %v4534_v48  ;;  %v1326_v18 = vmax.f32 %v1258_v23, %v1300_v6  ;;  %v1192_v0 = vmax.f32 %v4273_v13, %v1165_v45  ;;  %v3094_v15 = vunpack.i.h.bf16 %v4482_v32 }
 0x26b   : > { %v4587_v44 = vmax.f32 %v1327_v58, %v4258_v4  ;;  %v1234_v4 = vsel %vm1226_vm6, %v3083_v22, %v3084_v12  ;;  %v1235_v60 = vsel %vm1226_vm6, %v3084_v12, %v3138_v7  ;;  %v3133_v30 = vunpack.i.l.bf16 %v3132_v43 }
 0x26c   : > { %3166 = vrot.lane.b32.xlu0 %v4549_v31, %s3774_s13  ;;  %3161 = vrot.lane.b32.xlu1 %v4549_v31, %s3775_s14  ;;  %v4584_v19 = vmax.f32 %v1326_v18, %v4395_v54  ;;  %v3134_v54 = vunpack.i.h.bf16 %v3132_v43  ;;  %v1193_v55 = vmax.f32 %v4281_v20, %v1166_v37  ;;  %v1303_v13 = vsel %vm298_vm0, %v3094_v15, %v3148_v50 }
 0x26d   : > { %v1261_v33 = vmax.f32 %v1192_v0, %v1234_v4  ;;  %v3144_v22 = vunpack.i.h.bf16 %v4492_v39  ;;  %v3143_v61 = vunpack.i.l.bf16 %v4492_v39  ;;  %v1302_v2 = vsel %vm298_vm0, %v3093_v5, %v3094_v15 }
 0x26e   : > { %v3210_v16 = vpack.i.bf16 %v4587_v44, %v4584_v19  ;;  %v1262_v11 = vmax.f32 %v1193_v55, %v1235_v60  ;;  %v1169_v53 = vsel %vm1157_vm5, %v3133_v30, %v3134_v54  ;;  %v3154_v24 = vunpack.i.h.bf16 %v3152_v42 }
 0x26f   : > { %v1329_v47 = vmax.f32 %v1261_v33, %v1302_v2  ;;  %v1197_v43 = vmax.f32 %v4458_v51, %v3134_v54  ;;  %v3139_v41 = vunpack.i.h.bf16 %v3137_v38  ;;  %v1196_v52 = vmax.f32 %v4456_v3, %v1169_v53 }
 0x270   : > { %3181 = vrot.lane.b32.xlu0 %v3180_v63, %s3774_s13  ;;  %3171 = vrot.lane.b32.xlu1 %v4549_v31, %s3776_s15  ;;  %v1330_v56 = vmax.f32 %v1262_v11, %v1303_v13  ;;  %v1168_v39 = vsel %vm1157_vm5, %v3129_v57, %v3133_v30  ;;  %v1167_v1 = vsel %vm1157_vm5, %v3128_v14, %v3129_v57  ;;  %v3149_v5 = vunpack.i.h.bf16 %v4499_v40 }
 0x271   : > { %v1238_v32 = vsel %vm1226_vm6, %v3143_v61, %v3144_v22  ;;  %v1266_v27 = vmax.f32 %v1197_v43, %v3144_v22  ;;  %v1306_v25 = vsel %vm298_vm0, %v3153_v21, %v3154_v24  ;;  %v1237_v23 = vsel %vm1226_vm6, %v3139_v41, %v3143_v61 }
 0x272   : > { %v4623_v6 = vmax.f32 %v1330_v56, %v4452_v62  ;;  %v1265_v26 = vmax.f32 %v1196_v52, %v1238_v32  ;;  %v1195_v8 = vmax.f32 %v4454_v28, %v1168_v39  ;;  %v1194_v40 = vmax.f32 %v4452_v62, %v1167_v1 }
 0x273   : > { %v1236_v18 = vsel %vm1226_vm6, %v3138_v7, %v3139_v41  ;;  %v1334_v58 = vmax.f32 %v1266_v27, %v3154_v24  ;;  %v1305_v14 = vsel %vm298_vm0, %v3149_v5, %v3153_v21  ;;  %v1304_v12 = vsel %vm298_vm0, %v3148_v50, %v3149_v5 }
 0x274   : > { %3191 = vrot.lane.b32.xlu0 %v3180_v63, %s3777_s16  ;;  %3176 = vrot.lane.b32.xlu1 %v3180_v63, %s3775_s14  ;;  %v1333_v38 = vmax.f32 %v1265_v26, %v1306_v25  ;;  %v1264_v45 = vmax.f32 %v1195_v8, %v1237_v23  ;;  %v1263_v37 = vmax.f32 %v1194_v40, %v1236_v18 }
 0x275   : > { %v4642_v0 = vmax.f32 %v1334_v58, %v4318_v35 }
 0x276   : > { %v1332_v62 = vmax.f32 %v1264_v45, %v1305_v14  ;;  %v4645_v7 = vmax.f32 %v1333_v38, %v4458_v51  ;;  %v1331_v15 = vmax.f32 %v1263_v37, %v1304_v12 }
 0x278   : > { %3196 = vrot.lane.b32.xlu0 %v3195_v59, %s3775_s14  ;;  %3186 = vrot.lane.b32.xlu1 %v3180_v63, %s3776_s15  ;;  %v4627_v63 = vmax.f32 %v1329_v47, %v4281_v20  ;;  %v4650_v4 = vmax.f32 %v1331_v15, %v4454_v28  ;;  %v4653_v50 = vmax.f32 %v1332_v62, %v4456_v3 }
 0x27a   : > { %v3235_v20 = vpack.i.bf16 %v4623_v6, %v4627_v63  ;;  %v3265_v35 = vpack.i.bf16 %v4653_v50, %v4650_v4 }
 0x27c   : > { %3211 = vrot.lane.b32.xlu0 %v3210_v16, %s3774_s13  ;;  %3201 = vrot.lane.b32.xlu1 %v3210_v16, %s3775_s14 }
 0x280   : > { %3216 = vrot.lane.b32.xlu0 %v3195_v59, %s3776_s15  ;;  %3206 = vrot.lane.b32.xlu1 %v3195_v59, %s3774_s13 }
 0x284   : > { %3231 = vrot.lane.b32.xlu0 %v3210_v16, %s3777_s16  ;;  %3221 = vrot.lane.b32.xlu1 %v3210_v16, %s3776_s15 }
 0x288   : > { %3236 = vrot.lane.b32.xlu0 %v3235_v20, %s3775_s14  ;;  %3226 = vrot.lane.b32.xlu1 %v3195_v59, %s3777_s16  ;;  %v3260_v59 = vpack.i.bf16 %v4642_v0, %v4645_v7 }
 0x28c   : > { %3246 = vrot.lane.b32.xlu0 %v3235_v20, %s3776_s15  ;;  %3241 = vrot.lane.b32.xlu1 %v3235_v20, %s3774_s13 }
 0x290   : > { %3261 = vrot.lane.b32.xlu0 %v3260_v59, %s3775_s14  ;;  %3251 = vrot.lane.b32.xlu1 %v3235_v20, %s3777_s16 }
 0x294   : > { %3266 = vrot.lane.b32.xlu0 %v3265_v35, %s3774_s13  ;;  %3256 = vrot.lane.b32.xlu1 %v3265_v35, %s3775_s14 }
 0x298   : > { %3281 = vrot.lane.b32.xlu0 %v3260_v59, %s3776_s15  ;;  %3271 = vrot.lane.b32.xlu1 %v3260_v59, %s3774_s13 }
 0x29c   : > { %3286 = vrot.lane.b32.xlu0 %v3265_v35, %s3777_s16  ;;  %3276 = vrot.lane.b32.xlu1 %v3265_v35, %s3776_s15 }
 0x2a0   : > { %3296 = vrot.lane.b32.xlu0 %v4549_v31, %s3777_s16  ;;  %3291 = vrot.lane.b32.xlu1 %v3260_v59, %s3777_s16 }
 0x2de   : > { %v4670_v28 = vpop.permute.xlu0 %3166  ;;  %v4672_v3 = vpop.permute.xlu1 %3161 }
 0x2df   : > { %v3163_v26 = vunpack.i.l.bf16 %v4672_v3  ;;  %v3169_v35 = vunpack.i.h.bf16 %v4670_v28 }
 0x2e2   : > { %v4674_v51 = vpop.permute.xlu0 %3181  ;;  %v4676_v54 = vpop.permute.xlu1 %3171 }
 0x2e3   : > { %v3184_v53 = vunpack.i.h.bf16 %v4674_v51  ;;  %v3183_v56 = vunpack.i.l.bf16 %v4674_v51 }
 0x2e5   : > { %v1460_v1 = vsel %vm910_vm2, %v3183_v56, %v3184_v53 }
 0x2e6   : > { %v4678_v60 = vpop.permute.xlu0 %3191  ;;  %v3177_v30 = vpop.permute.xlu1 %3176 }
 0x2e7   : > { %v3179_v13 = vunpack.i.h.bf16 %v3177_v30  ;;  %v3178_v33 = vunpack.i.l.bf16 %v3177_v30  ;;  %v3194_v20 = vunpack.i.h.bf16 %v4678_v60  ;;  %v3193_v45 = vunpack.i.l.bf16 %v4678_v60 }
 0x2e9   : > { %v1392_v57 = vsel %vm831_vm1, %v3178_v33, %v3179_v13  ;;  %v1391_v37 = vsel %vm831_vm1, %v3163_v26, %v3178_v33  ;;  %v3173_v33 = vunpack.i.l.bf16 %v4676_v54 }
 0x2ea   : > { %v4680_v55 = vpop.permute.xlu0 %3196  ;;  %v4682_v16 = vpop.permute.xlu1 %3186  ;;  %v1418_v47 = vmax.f32 %v4552_v49, %v1392_v57 }
 0x2eb   : > { %v3198_v22 = vunpack.i.l.bf16 %v4680_v55  ;;  %v3188_v52 = vunpack.i.l.bf16 %v4682_v16 }
 0x2ec   : > { %v1486_v25 = vmax.f32 %v1418_v47, %v1460_v1  ;;  %v1417_v47 = vmax.f32 %v4534_v48, %v1391_v37 }
 0x2ed   : > { %v1393_v41 = vsel %vm831_vm1, %v3179_v13, %v3198_v22  ;;  %v3168_v13 = vunpack.i.l.bf16 %v4670_v28 }
 0x2ee   : > { %v4684_v31 = vpop.permute.xlu0 %3211  ;;  %v4686_v11 = vpop.permute.xlu1 %3201  ;;  %v1419_v27 = vmax.f32 %v4545_v34, %v1393_v41  ;;  %v3199_v41 = vunpack.i.h.bf16 %v4680_v55 }
 0x2ef   : > { %v3204_v42 = vunpack.i.h.bf16 %v4686_v11  ;;  %v3214_v2 = vunpack.i.h.bf16 %v4684_v31  ;;  %v3203_v18 = vunpack.i.l.bf16 %v4686_v11 }
 0x2f1   : > { %v1423_v61 = vmax.f32 %v4587_v44, %v3204_v42  ;;  %v3189_v44 = vunpack.i.h.bf16 %v4682_v16  ;;  %v1396_v57 = vsel %vm831_vm1, %v3203_v18, %v3204_v42 }
 0x2f2   : > { %v4695_v24 = vpop.permute.xlu0 %3216  ;;  %v4697_v21 = vpop.permute.xlu1 %3206  ;;  %v1422_v26 = vmax.f32 %v4584_v19, %v1396_v57 }
 0x2f3   : > { %v3208_v43 = vunpack.i.l.bf16 %v4697_v21  ;;  %v1491_v39 = vmax.f32 %v1423_v61, %v3214_v2  ;;  %v1528_v8 = vsel %vm989_vm3, %v3188_v52, %v3189_v44  ;;  %v5636_v40 = vunpack.i.l.bf16 %v4695_v24 }
 0x2f4   : > { %v1554_v62 = vmax.f32 %v1486_v25, %v1528_v8  ;;  %v1459_v25 = vsel %vm910_vm2, %v3168_v13, %v3183_v56  ;;  %v1394_v56 = vsel %vm831_vm1, %v3198_v22, %v3199_v41 }
 0x2f5   : > { %v1461_v32 = vsel %vm910_vm2, %v3184_v53, %v3208_v43  ;;  %v1529_v51 = vsel %vm989_vm3, %v3189_v44, %v5636_v40  ;;  %v4749_v53 = vsel %vm1068_vm4, %v3193_v45, %v3194_v20  ;;  %v4785_v19 = vmax.f32 %v1417_v47, %v1459_v25 }
 0x2f6   : > { %v4712_v49 = vpop.permute.xlu0 %3231  ;;  %v4714_v5 = vpop.permute.xlu1 %3221  ;;  %v1487_v58 = vmax.f32 %v1419_v27, %v1461_v32  ;;  %v4763_v42 = vmax.f32 %v1554_v62, %v4749_v53  ;;  %v3213_v32 = vunpack.i.l.bf16 %v4684_v31  ;;  %v3174_v31 = vunpack.i.h.bf16 %v4676_v54 }
 0x2f7   : > { %v3224_v23 = vunpack.i.h.bf16 %v4714_v5  ;;  %v3234_v38 = vunpack.i.h.bf16 %v4712_v49  ;;  %v5639_v8 = vunpack.i.l.bf16 %v4714_v5  ;;  %v3233_v25 = vunpack.i.l.bf16 %v4712_v49 }
 0x2f8   : > { %v1555_v61 = vmax.f32 %v1487_v58, %v1529_v51  ;;  %v3164_v51 = vunpack.i.h.bf16 %v4672_v3  ;;  %v1464_v40 = vsel %vm910_vm2, %v3213_v32, %v3214_v2  ;;  %v3209_v3 = vunpack.i.h.bf16 %v4697_v21 }
 0x2f9   : > { %v1559_v14 = vmax.f32 %v1491_v39, %v3224_v23  ;;  %v1490_v2 = vmax.f32 %v1422_v26, %v1464_v40  ;;  %v4828_v26 = vsel %vm831_vm1, %v3199_v41, %v3203_v18  ;;  %v1600_v21 = vsel %vm1068_vm4, %v3233_v25, %v3234_v38 }
 0x2fa   : > { %v4725_v34 = vpop.permute.xlu0 %3236  ;;  %v4727_v12 = vpop.permute.xlu1 %3226 }
 0x2fb   : > { %v4732_v15 = vmax.f32 %v1559_v14, %v3234_v38  ;;  %v5635_v59 = vunpack.i.h.bf16 %v4725_v34  ;;  %v3238_v30 = vunpack.i.l.bf16 %v4725_v34  ;;  %v3228_v16 = vunpack.i.l.bf16 %v4727_v12 }
 0x2fd   : > { %v4756_v44 = vsel %vm1068_vm4, %v3194_v20, %v3228_v16  ;;  %v1398_v48 = vsel %vm831_vm1, %v3238_v30, %v5635_v59  ;;  %v4791_v59 = vsel %vm989_vm3, %v3173_v33, %v3188_v52 }
 0x2fe   : > { %v4758_v39 = vpop.permute.xlu0 %3246  ;;  %v4760_v1 = vpop.permute.xlu1 %3241  ;;  %v4770_v27 = vmax.f32 %v1555_v61, %v4756_v44  ;;  %v1425_v13 = vmax.f32 %v4627_v63, %v1398_v48  ;;  %v1532_v63 = vsel %vm989_vm3, %v5639_v8, %v3224_v23  ;;  %v1420_v48 = vmax.f32 %v4571_v29, %v1394_v56 }
 0x2ff   : > { %v5638_v58 = vunpack.i.h.bf16 %v4758_v39  ;;  %v3248_v14 = vunpack.i.l.bf16 %v4758_v39  ;;  %v5637_v20 = vunpack.i.h.bf16 %v4760_v1  ;;  %v3243_v37 = vunpack.i.l.bf16 %v4760_v1 }
 0x300   : > { %v3310_v62 = vpack.i.bf16 %v4770_v27, %v4763_v42  ;;  %v1553_v40 = vmax.f32 %v4785_v19, %v4791_v59  ;;  %v1558_v29 = vmax.f32 %v1490_v2, %v1532_v63  ;;  %v3229_v8 = vunpack.i.h.bf16 %v4727_v12 }
 0x301   : > { %v1466_v55 = vsel %vm910_vm2, %v3243_v37, %v5637_v20  ;;  %v1534_v47 = vsel %vm989_vm3, %v3248_v14, %v5638_v58  ;;  %v3219_v63 = vunpack.i.h.bf16 %v4695_v24  ;;  %v5672_v19 = vmax.f32 %v4574_v36, %v4828_v26 }
 0x302   : > { %v3262_v57 = vpop.permute.xlu0 %3261  ;;  %v4788_v61 = vpop.permute.xlu1 %3251  ;;  %3311 = vrot.lane.b32.xlu1 %v3310_v62, %s3779_s18  ;;  %v1493_v22 = vmax.f32 %v1425_v13, %v1466_v55  ;;  %v1462_v55 = vsel %vm910_vm2, %v3208_v43, %v3209_v3  ;;  %v1465_v43 = vsel %vm910_vm2, %v3169_v35, %v3243_v37  ;;  %v4854_v2 = vmax.f32 %v1558_v29, %v1600_v21 }
 0x303   : > { %v3254_v52 = vunpack.i.h.bf16 %v4788_v61  ;;  %v3253_v33 = vunpack.i.l.bf16 %v4788_v61  ;;  %v3263_v58 = vunpack.i.l.bf16 %v3262_v57  ;;  %v4863_v35 = vsel %vm1068_vm4, %v3228_v16, %v3229_v8 }
 0x304   : > { %v1561_v20 = vmax.f32 %v1493_v22, %v1534_v47  ;;  %v1397_v22 = vsel %vm831_vm1, %v3164_v51, %v3238_v30  ;;  %v3264_v47 = vunpack.i.h.bf16 %v3262_v57  ;;  %v4852_v57 = vmax.f32 %v1420_v48, %v1462_v55 }
 0x305   : > { %v4817_v23 = vsel %vm1068_vm4, %v3253_v33, %v3254_v52  ;;  %v1424_v56 = vmax.f32 %v4537_v9, %v1397_v22  ;;  %v5674_v36 = vunpack.i.h.bf16 %v4725_v34 }
 0x306   : > { %v4819_v13 = vpop.permute.xlu0 %3266  ;;  %v4821_v54 = vpop.permute.xlu1 %3256  ;;  %3321 = vrot.lane.b32.xlu1 %v3310_v62, %s3778_s17  ;;  %v4839_v11 = vmax.f32 %v1561_v20, %v4817_v23  ;;  %v1463_v20 = vsel %vm910_vm2, %v3209_v3, %v3213_v32  ;;  %v1430_v49 = vmax.f32 %v4642_v0, %v3264_v47  ;;  %v1402_v38 = vsel %vm831_vm1, %v3263_v58, %v3264_v47 }
 0x307   : > { %v3259_v18 = vunpack.i.h.bf16 %v4821_v54  ;;  %v1492_v32 = vmax.f32 %v1424_v56, %v1465_v43  ;;  %v1429_v12 = vmax.f32 %v4645_v7, %v1402_v38 }
 0x308   : > { %v3340_v9 = vpack.i.bf16 %v4839_v11, %v4854_v2 }
 0x309   : > { %v1401_v37 = vsel %vm831_vm1, %v3259_v18, %v3263_v58 }
 0x30a   : > { %v3282_v30 = vpop.permute.xlu0 %3281  ;;  %v3272_v51 = vpop.permute.xlu1 %3271  ;;  %3331 = vrot.lane.b32.xlu1 %v3310_v62, %s3780_s19  ;;  %v3269_v62 = vunpack.i.h.bf16 %v4819_v13  ;;  %v1428_v58 = vmax.f32 %v4653_v50, %v1401_v37  ;;  %v1533_v50 = vsel %vm989_vm3, %v3174_v31, %v3248_v14 }
 0x30b   : > { %v3274_v41 = vunpack.i.h.bf16 %v3272_v51  ;;  %v3273_v28 = vunpack.i.l.bf16 %v3272_v51  ;;  %v3284_v0 = vunpack.i.h.bf16 %v3282_v30  ;;  %v3283_v16 = vunpack.i.l.bf16 %v3282_v30 }
 0x30c   : > { %v4888_v30 = vsel %vm1068_vm4, %v3229_v8, %v3233_v25 }
 0x30d   : > { %v1498_v3 = vmax.f32 %v1430_v49, %v3274_v41  ;;  %v1470_v48 = vsel %vm910_vm2, %v3273_v28, %v3274_v41  ;;  %v1469_v47 = vsel %vm910_vm2, %v3269_v62, %v3273_v28 }
 0x30e   : > { %v3287_v29 = vpop.permute.xlu0 %3286  ;;  %v4872_v55 = vpop.permute.xlu1 %3276  ;;  %3341 = vrot.lane.b32.xlu1 %v3340_v9, %s3779_s18  ;;  %v1497_v41 = vmax.f32 %v1429_v12, %v1470_v48 }
 0x30f   : > { %v3289_v56 = vunpack.i.h.bf16 %v3287_v29  ;;  %v3288_v22 = vunpack.i.l.bf16 %v3287_v29  ;;  %v3279_v21 = vunpack.i.h.bf16 %v4872_v55  ;;  %v1566_v43 = vmax.f32 %v1498_v3, %v3284_v0 }
 0x310   : > { %v1496_v3 = vmax.f32 %v1428_v58, %v1469_v47  ;;  %v1560_v29 = vmax.f32 %v1492_v32, %v1533_v50 }
 0x311   : > { %v4882_v51 = vsel %vm1068_vm4, %v3254_v52, %v3288_v22  ;;  %v4885_v7 = vsel %vm1068_vm4, %v3288_v22, %v3289_v56  ;;  %v1537_v38 = vsel %vm989_vm3, %v3279_v21, %v3283_v16  ;;  %v1538_v52 = vsel %vm989_vm3, %v3283_v16, %v3284_v0 }
 0x312   : > { %v3297_v28 = vpop.permute.xlu0 %3296  ;;  %v3292_v37 = vpop.permute.xlu1 %3291  ;;  %3346 = vrot.lane.b32.xlu1 %v3340_v9, %s3778_s17  ;;  %v1564_v31 = vmax.f32 %v1496_v3, %v1537_v38  ;;  %v1565_v49 = vmax.f32 %v1497_v41, %v1538_v52  ;;  %v3258_v41 = vunpack.i.l.bf16 %v4821_v54 }
 0x313   : > { %v3299_v48 = vunpack.i.h.bf16 %v3297_v28  ;;  %v3298_v8 = vunpack.i.l.bf16 %v3297_v28  ;;  %v3294_v25 = vunpack.i.h.bf16 %v3292_v37  ;;  %v3293_v12 = vunpack.i.l.bf16 %v3292_v37 }
 0x314   : > { %v1399_v26 = vsel %vm831_vm1, %v5674_v36, %v3258_v41 }
 0x315   : > { %v1601_v22 = vsel %vm1068_vm4, %v3299_v48, %v3253_v33  ;;  %v1595_v0 = vsel %vm1068_vm4, %v3298_v8, %v3193_v45  ;;  %v4909_v32 = vsel %vm1068_vm4, %v3289_v56, %v3293_v12  ;;  %v1606_v58 = vsel %vm1068_vm4, %v3293_v12, %v3294_v25 }
 0x316   : > { %v4906_v16 = vmax.f32 %v1560_v29, %v1601_v22  ;;  %v4915_v47 = vmax.f32 %v1553_v40, %v1595_v0  ;;  %v4918_v61 = vmax.f32 %v1564_v31, %v4909_v32  ;;  %v4920_v33 = vmax.f32 %v1565_v49, %v1606_v58  ;;  %3351 = vrot.lane.b32.xlu1 %v3340_v9, %s3780_s19 }
 0x317   : > { %v4922_v60 = vmax.f32 %v1566_v43, %v3294_v25  ;;  %v5671_v45 = vunpack.i.l.bf16 %v4714_v5  ;;  %v1489_v40 = vmax.f32 %v5672_v19, %v1463_v20  ;;  %v5673_v5 = vunpack.i.l.bf16 %v4695_v24 }
 0x318   : > { %v3360_v43 = vpack.i.bf16 %v4920_v33, %v4918_v61  ;;  %v3300_v9 = vpack.i.bf16 %v4906_v16, %v4915_v47  ;;  %v1400_v20 = vsel %vm831_vm1, %v3258_v41, %v3259_v18  ;;  %v1426_v37 = vmax.f32 %v4623_v6, %v1399_v26 }
 0x319   : > { %v1531_v56 = vsel %vm989_vm3, %v3219_v63, %v5671_v45  ;;  %v1530_v50 = vsel %vm989_vm3, %v5673_v5, %v3219_v63  ;;  %v3268_v63 = vunpack.i.l.bf16 %v4819_v13  ;;  %v1427_v34 = vmax.f32 %v4650_v4, %v1400_v20 }
 0x31a   : > { %v1557_v49 = vmax.f32 %v1489_v40, %v1531_v56  ;;  %v1556_v38 = vmax.f32 %v4852_v57, %v1530_v50  ;;  %3361 = vrot.lane.b32.xlu1 %v3360_v43, %s3779_s18  ;;  %3301 = vrot.lane.b32.xlu0 %v3300_v9, %s3779_s18  ;;  %v3278_v57 = vunpack.i.l.bf16 %v4872_v55  ;;  %v5675_v18 = vunpack.i.h.bf16 %v4760_v1 }
 0x31b   : > { %v1468_v3 = vsel %vm910_vm2, %v3268_v63, %v3269_v62  ;;  %v5676_v55 = vunpack.i.h.bf16 %v4758_v39 }
 0x31c   : > { %v4955_v28 = vmax.f32 %v1556_v38, %v4863_v35  ;;  %v4958_v24 = vmax.f32 %v1557_v49, %v4888_v30  ;;  %v1467_v52 = vsel %vm910_vm2, %v5675_v18, %v3268_v63  ;;  %v1536_v4 = vsel %vm989_vm3, %v3278_v57, %v3279_v21 }
 0x31d   : > { %v1535_v6 = vsel %vm989_vm3, %v5676_v55, %v3278_v57  ;;  %v1494_v48 = vmax.f32 %v1426_v37, %v1467_v52  ;;  %v1495_v29 = vmax.f32 %v1427_v34, %v1468_v3 }
 0x31e   : > { %3371 = vrot.lane.b32.xlu1 %v3360_v43, %s3778_s17  ;;  %3306 = vrot.lane.b32.xlu0 %v3300_v9, %s3778_s17  ;;  %v3315_v54 = vpack.i.bf16 %v4958_v24, %v4955_v28 }
 0x31f   : > { %v1562_v8 = vmax.f32 %v1494_v48, %v1535_v6  ;;  %v1563_v1 = vmax.f32 %v1495_v29, %v1536_v4 }
 0x321   : > { %v4982_v13 = vmax.f32 %v1562_v8, %v4882_v51  ;;  %v4985_v62 = vmax.f32 %v1563_v1, %v4885_v7 }
 0x322   : > { %3381 = vrot.lane.b32.xlu1 %v3360_v43, %s3780_s19  ;;  %3316 = vrot.lane.b32.xlu0 %v3315_v54, %s3779_s18 }
 0x323   : > { %v3355_v39 = vpack.i.bf16 %v4985_v62, %v4982_v13 }
 0x326   : > { %3326 = vrot.lane.b32.xlu0 %v3315_v54, %s3778_s17 }
 0x32a   : > { %3336 = vrot.lane.b32.xlu0 %v3315_v54, %s3780_s19 }
 0x32e   : > { %3356 = vrot.lane.b32.xlu0 %v3355_v39, %s3779_s18 }
 0x332   : > { %3366 = vrot.lane.b32.xlu0 %v3355_v39, %s3778_s17 }
 0x336   : > { %3376 = vrot.lane.b32.xlu0 %v3355_v39, %s3780_s19 }
 0x33a   : > { %3386 = vrot.lane.b32.xlu0 %v3300_v9, %s3780_s19 }
 0x374   : > { %v4994_v21 = vpop.permute.xlu1 %3311 }
 0x375   : > { %v3314_v56 = vunpack.i.h.bf16 %v4994_v21  ;;  %v3313_v41 = vunpack.i.l.bf16 %v4994_v21 }
 0x377   : > { %v1672_v36 = vsel %vm1157_vm5, %v3313_v41, %v3314_v56 }
 0x378   : > { %v4996_v25 = vpop.permute.xlu1 %3321  ;;  %v1694_v3 = vmax.f32 %v4763_v42, %v1672_v36 }
 0x379   : > { %v3324_v43 = vunpack.i.h.bf16 %v4996_v25  ;;  %v3323_v9 = vunpack.i.l.bf16 %v4996_v25 }
 0x37b   : > { %v1730_v18 = vsel %vm1226_vm6, %v3323_v9, %v3324_v43 }
 0x37c   : > { %v4998_v12 = vpop.permute.xlu1 %3331 }
 0x37d   : > { %v3334_v49 = vunpack.i.h.bf16 %v4998_v12  ;;  %v3333_v38 = vunpack.i.l.bf16 %v4998_v12 }
 0x37f   : > { %v1788_v55 = vsel %vm298_vm0, %v3333_v38, %v3334_v49 }
 0x380   : > { %v5000_v31 = vpop.permute.xlu1 %3341 }
 0x381   : > { %v3343_v5 = vunpack.i.l.bf16 %v5000_v31 }
 0x384   : > { %v5004_v0 = vpop.permute.xlu1 %3346 }
 0x385   : > { %v3348_v63 = vunpack.i.l.bf16 %v5004_v0 }
 0x388   : > { %v5008_v45 = vpop.permute.xlu1 %3351 }
 0x38c   : > { %v5002_v22 = vpop.permute.xlu0 %3301  ;;  %v5022_v57 = vpop.permute.xlu1 %3361 }
 0x390   : > { %v5006_v58 = vpop.permute.xlu0 %3306  ;;  %v5040_v59 = vpop.permute.xlu1 %3371 }
 0x394   : > { %v3317_v19 = vpop.permute.xlu0 %3316 }
 0x395   : > { %v3319_v40 = vunpack.i.h.bf16 %v3317_v19  ;;  %v3318_v50 = vunpack.i.l.bf16 %v3317_v19  ;;  %v3353_v19 = vunpack.i.l.bf16 %v5008_v45 }
 0x397   : > { %v1675_v26 = vsel %vm1157_vm5, %v3319_v40, %v3343_v5  ;;  %v1673_v37 = vsel %vm1157_vm5, %v3314_v56, %v3318_v50  ;;  %v1674_v34 = vsel %vm1157_vm5, %v3318_v50, %v3319_v40  ;;  %v1752_v56 = vmax.f32 %v1694_v3, %v1730_v18 }
 0x398   : > { %v3327_v20 = vpop.permute.xlu0 %3326  ;;  %v1697_v6 = vmax.f32 %v4958_v24, %v1675_v26  ;;  %v1695_v48 = vmax.f32 %v4770_v27, %v1673_v37  ;;  %v1696_v29 = vmax.f32 %v4955_v28, %v1674_v34 }
 0x399   : > { %v3329_v54 = vunpack.i.h.bf16 %v3327_v20  ;;  %v3328_v52 = vunpack.i.l.bf16 %v3327_v20  ;;  %v1810_v26 = vmax.f32 %v1752_v56, %v1788_v55  ;;  %v5640_v55 = vunpack.i.l.bf16 %v5022_v57 }
 0x39b   : > { %v1733_v4 = vsel %vm1226_vm6, %v3329_v54, %v3348_v63  ;;  %v1731_v8 = vsel %vm1226_vm6, %v3324_v43, %v3328_v52  ;;  %v1732_v1 = vsel %vm1226_vm6, %v3328_v52, %v3329_v54 }
 0x39c   : > { %v3337_v39 = vpop.permute.xlu0 %3336  ;;  %v1753_v36 = vmax.f32 %v1695_v48, %v1731_v8  ;;  %v1754_v20 = vmax.f32 %v1696_v29, %v1732_v1  ;;  %v1755_v14 = vmax.f32 %v1697_v6, %v1733_v4  ;;  %v1698_v48 = vmax.f32 %v4854_v2, %v3343_v5 }
 0x39d   : > { %v3339_v40 = vunpack.i.h.bf16 %v3337_v39  ;;  %v3338_v50 = vunpack.i.l.bf16 %v3337_v39  ;;  %v3364_v6 = vunpack.i.h.bf16 %v5022_v57  ;;  %v3304_v5 = vunpack.i.h.bf16 %v5002_v22 }
 0x39e   : > { %v3303_v1 = vunpack.i.l.bf16 %v5002_v22  ;;  %v3344_v39 = vunpack.i.h.bf16 %v5000_v31  ;;  %v1756_v56 = vmax.f32 %v1698_v48, %v3348_v63  ;;  %v3354_v22 = vunpack.i.h.bf16 %v5008_v45 }
 0x39f   : > { %v1791_v37 = vsel %vm298_vm0, %v3339_v40, %v3353_v19  ;;  %v1789_v43 = vsel %vm298_vm0, %v3334_v49, %v3338_v50  ;;  %v1790_v34 = vsel %vm298_vm0, %v3338_v50, %v3339_v40  ;;  %v5077_v50 = vpop.permute.xlu1 %3381  ;;  %v1680_v63 = vsel %vm1157_vm5, %v5640_v55, %v3364_v6 }
 0x3a0   : > { %v1811_v54 = vmax.f32 %v1753_v36, %v1789_v43  ;;  %v1812_v18 = vmax.f32 %v1754_v20, %v1790_v34  ;;  %v1813_v52 = vmax.f32 %v1755_v14, %v1791_v37  ;;  %v5047_v3 = vpop.permute.xlu0 %3356  ;;  %v5063_v14 = vmax.f32 %v1810_v26, %v4770_v27 }
 0x3a1   : > { %v3358_v8 = vunpack.i.l.bf16 %v5047_v3  ;;  %v3373_v27 = vunpack.i.l.bf16 %v5040_v59  ;;  %v1671_v26 = vsel %vm1157_vm5, %v3303_v1, %v3313_v41  ;;  %v3309_v37 = vunpack.i.h.bf16 %v5006_v58 }
 0x3a2   : > { %v5053_v4 = vmax.f32 %v1811_v54, %v4955_v28  ;;  %v5056_v29 = vmax.f32 %v1812_v18, %v4958_v24  ;;  %v5059_v49 = vmax.f32 %v1813_v52, %v4854_v2  ;;  %v3349_v28 = vunpack.i.h.bf16 %v5004_v0 }
 0x3a3   : > { %v3374_v24 = vunpack.i.h.bf16 %v5040_v59  ;;  %v1704_v0 = vmax.f32 %v4920_v33, %v3364_v6  ;;  %v1677_v20 = vsel %vm1157_vm5, %v3344_v39, %v3358_v8  ;;  %v1676_v59 = vsel %vm1157_vm5, %v3304_v5, %v3344_v39 }
 0x3a4   : > { %v5069_v40 = vpop.permute.xlu0 %3366  ;;  %v5073_v2 = vpack.i.bf16 %v5059_v49, %v5056_v29  ;;  %v5082_v31 = vpack.i.bf16 %v5053_v4, %v5063_v14  ;;  %v3308_v43 = vunpack.i.l.bf16 %v5006_v58  ;;  %v3384_v34 = vunpack.i.h.bf16 %v5077_v50 }
 0x3a5   : > { %v3368_v36 = vunpack.i.l.bf16 %v5069_v40  ;;  %v3383_v54 = vunpack.i.l.bf16 %v5077_v50  ;;  %v1738_v48 = vsel %vm1226_vm6, %v3373_v27, %v3374_v24  ;;  %v1700_v21 = vmax.f32 %v4839_v11, %v1677_v20 }
 0x3a6   : > { %3396 = vrot.lane.b32.xlu0 %v5073_v2, %s3775_s14  ;;  %3391 = vrot.lane.b32.xlu1 %v5082_v31, %s3775_s14  ;;  %v1703_v41 = vmax.f32 %v4918_v61, %v1680_v63  ;;  %v1699_v5 = vmax.f32 %v4906_v16, %v1676_v59  ;;  %v1693_v58 = vmax.f32 %v4915_v47, %v1671_v26  ;;  %v3359_v47 = vunpack.i.h.bf16 %v5047_v3 }
 0x3a7   : > { %v1735_v18 = vsel %vm1226_vm6, %v3349_v28, %v3368_v36  ;;  %v1762_v1 = vmax.f32 %v1704_v0, %v3374_v24  ;;  %v1734_v39 = vsel %vm1226_vm6, %v3309_v37, %v3349_v28  ;;  %v1729_v50 = vsel %vm1226_vm6, %v3308_v43, %v3323_v9 }
 0x3a8   : > { %v3377_v52 = vpop.permute.xlu0 %3376  ;;  %v1758_v55 = vmax.f32 %v1700_v21, %v1735_v18  ;;  %v1761_v63 = vmax.f32 %v1703_v41, %v1738_v48  ;;  %v1796_v16 = vsel %vm298_vm0, %v3383_v54, %v3384_v34  ;;  %v1814_v25 = vmax.f32 %v1756_v56, %v3353_v19 }
 0x3a9   : > { %v3378_v6 = vunpack.i.l.bf16 %v3377_v52  ;;  %v1751_v28 = vmax.f32 %v1693_v58, %v1729_v50  ;;  %v1757_v9 = vmax.f32 %v1699_v5, %v1734_v39  ;;  %v1820_v37 = vmax.f32 %v1762_v1, %v3384_v34 }
 0x3aa   : > { %3406 = vrot.lane.b32.xlu0 %v5073_v2, %s3774_s13  ;;  %3401 = vrot.lane.b32.xlu1 %v5082_v31, %s3774_s13  ;;  %v1819_v43 = vmax.f32 %v1761_v63, %v1796_v16  ;;  %v3369_v18 = vunpack.i.h.bf16 %v5069_v40  ;;  %v5677_v45 = vunpack.i.l.bf16 %v5022_v57  ;;  %v1678_v34 = vsel %vm1157_vm5, %v3358_v8, %v3359_v47  ;;  %v5680_v63 = vld [vmem:[#allocation4_spill] sm:$0xff]  ;;  %v5681_v16 = vld [vmem:[#allocation3_spill] sm:$0xff] }
 0x3ab   : > { %v1793_v20 = vsel %vm298_vm0, %v3354_v22, %v3378_v6  ;;  %v3379_v21 = vunpack.i.h.bf16 %v3377_v52  ;;  %v1832_v8 = vmax.f32 %v1820_v37, %v4922_v60  ;;  %v1701_v52 = vmax.f32 %v4982_v13, %v1678_v34 }
 0x3ac   : > { %v3387_v24 = vpop.permute.xlu0 %3386  ;;  %v1816_v0 = vmax.f32 %v1758_v55, %v1793_v20  ;;  %v1679_v19 = vsel %vm1157_vm5, %v3359_v47, %v5677_v45  ;;  %v1737_v57 = vsel %vm1226_vm6, %v3369_v18, %v3373_v27  ;;  %v1736_v41 = vsel %vm1226_vm6, %v3368_v36, %v3369_v18  ;;  %v5679_v20 = vld [vmem:[#allocation7_spill] sm:$0xff]  ;;  %v5682_v47 = vld [vmem:[#allocation6_spill] sm:$0xff] }
 0x3ad   : > { %v3389_v59 = vunpack.i.h.bf16 %v3387_v24  ;;  %v3388_v26 = vunpack.i.l.bf16 %v3387_v24  ;;  %v5158_v5 = vmax.f32 %v1819_v43, %v4920_v33  ;;  %v1794_v27 = vsel %vm298_vm0, %v3378_v6, %v3379_v21 }
 0x3ae   : > { %3416 = vrot.lane.b32.xlu0 %v5073_v2, %s3776_s15  ;;  %3411 = vrot.lane.b32.xlu1 %v5082_v31, %s3776_s15  ;;  %v5135_v40 = vmax.f32 %v1816_v0, %v4982_v13  ;;  %v1759_v58 = vmax.f32 %v1701_v52, %v1736_v41  ;;  %v3530_v24 = vpack.i.bf16 %v5682_v47, %v5681_v16 }
 0x3af   : > { %v1792_v48 = vsel %vm298_vm0, %v3389_v59, %v3354_v22  ;;  %v1787_v3 = vsel %vm298_vm0, %v3388_v26, %v3333_v38  ;;  %v1826_v38 = vmax.f32 %v1814_v25, %v4732_v15  ;;  %v1795_v15 = vsel %vm298_vm0, %v3379_v21, %v3383_v54 }
 0x3b0   : > { %v1809_v55 = vmax.f32 %v1751_v28, %v1787_v3  ;;  %v1815_v56 = vmax.f32 %v1757_v9, %v1792_v48  ;;  %v1817_v60 = vmax.f32 %v1759_v58, %v1794_v27  ;;  %v3455_v39 = vpack.i.bf16 %v1832_v8, %v5158_v5 }
 0x3b1   : > { %v3445_v36 = vpack.i.bf16 %v5135_v40, %v1826_v38 }
 0x3b2   : > { %v5138_v22 = vmax.f32 %v1809_v55, %v4763_v42  ;;  %v5141_v12 = vmax.f32 %v1815_v56, %v4839_v11  ;;  %3426 = vrot.lane.b32.xlu0 %v5073_v2, %s3777_s16  ;;  %3421 = vrot.lane.b32.xlu1 %v5082_v31, %s3777_s16  ;;  %v1702_v42 = vmax.f32 %v4985_v62, %v1679_v19 }
 0x3b3   : > { %v5171_v33 = vmax.f32 %v1817_v60, %v4985_v62  ;;  %v5678_v62 = vld [vmem:[#allocation5_spill] sm:$0xff] }
 0x3b4   : > { %v5155_v11 = vpack.i.bf16 %v5141_v12, %v5138_v22  ;;  %v1760_v1 = vmax.f32 %v1702_v42, %v1737_v57  ;;  %v3510_v50 = vpack.i.bf16 %v5678_v62, %v3960_v10 }
 0x3b6   : > { %3431 = vrot.lane.b32.xlu0 %v5155_v11, %s3775_s14  ;;  %3446 = vrot.lane.b32.xlu1 %v3445_v36, %s3775_s14  ;;  %v1818_v13 = vmax.f32 %v1760_v1, %v1795_v15 }
 0x3b8   : > { %v5174_v54 = vmax.f32 %v1818_v13, %v4918_v61  ;;  %v3515_v61 = vpack.i.bf16 %v4047_v17, %v4017_v46  ;;  %v3545_v46 = vpack.i.bf16 %v5171_v33, %v5135_v40 }
 0x3ba   : > { %3436 = vrot.lane.b32.xlu0 %v5155_v11, %s3774_s13  ;;  %3456 = vrot.lane.b32.xlu1 %v3455_v39, %s3775_s14  ;;  %v3450_v6 = vpack.i.bf16 %v5174_v54, %v5171_v33  ;;  %v3550_v10 = vpack.i.bf16 %v5158_v5, %v5174_v54 }
 0x3be   : > { %3441 = vrot.lane.b32.xlu0 %v5155_v11, %s3776_s15  ;;  %3461 = vrot.lane.b32.xlu1 %v3445_v36, %s3774_s13 }
 0x3c2   : > { %3451 = vrot.lane.b32.xlu0 %v3450_v6, %s3775_s14  ;;  %3471 = vrot.lane.b32.xlu1 %v3455_v39, %s3774_s13 }
 0x3c6   : > { %3466 = vrot.lane.b32.xlu0 %v3450_v6, %s3774_s13  ;;  %3476 = vrot.lane.b32.xlu1 %v3445_v36, %s3776_s15 }
 0x3ca   : > { %3481 = vrot.lane.b32.xlu0 %v3450_v6, %s3776_s15  ;;  %3486 = vrot.lane.b32.xlu1 %v3455_v39, %s3776_s15 }
 0x3ce   : > { %3496 = vrot.lane.b32.xlu0 %v3450_v6, %s3777_s16  ;;  %3491 = vrot.lane.b32.xlu1 %v3445_v36, %s3777_s16 }
 0x3d2   : > { %3506 = vrot.lane.b32.xlu0 %v5155_v11, %s3777_s16  ;;  %3501 = vrot.lane.b32.xlu1 %v3455_v39, %s3777_s16  ;;  %s2810_s16 = sshll.u32 %s5689_s22, 7 }
 0x3d6   : > { %3516 = vrot.lane.b32.xlu0 %v3515_v61, %s3781_s20  ;;  %3511 = vrot.lane.b32.xlu1 %v3510_v50, %s3781_s20 }
 0x3da   : > { %3526 = vrot.lane.b32.xlu0 %v5679_v20, %s3781_s20  ;;  %3521 = vrot.lane.b32.xlu1 %v5680_v63, %s3781_s20 }
 0x3de   : > { %3536 = vrot.lane.b32.xlu0 %v5082_v31, %s3782_s23  ;;  %3531 = vrot.lane.b32.xlu1 %v3530_v24, %s3781_s20 }
 0x3e2   : > { %3546 = vrot.lane.b32.xlu0 %v3545_v46, %s3782_s23  ;;  %3541 = vrot.lane.b32.xlu1 %v5073_v2, %s3782_s23 }
 0x3e6   : > { %3551 = vrot.lane.b32.xlu1 %v3550_v10, %s3782_s23 }
 0x418   : > { %v5210_v17 = vpop.permute.xlu0 %3396  ;;  %v5212_v0 = vpop.permute.xlu1 %3391 }
 0x419   : > { %v3398_v31 = vunpack.i.l.bf16 %v5210_v17  ;;  %v3394_v59 = vunpack.i.h.bf16 %v5212_v0  ;;  %v3393_v26 = vunpack.i.l.bf16 %v5212_v0  ;;  %v3399_v62 = vunpack.i.h.bf16 %v5210_v17 }
 0x41b   : > { %v1871_v43 = vsel %vm831_vm1, %v3394_v59, %v3398_v31  ;;  %v1870_v18 = vsel %vm831_vm1, %v3393_v26, %v3394_v59  ;;  %v1872_v47 = vsel %vm831_vm1, %v3398_v31, %v3399_v62 }
 0x41c   : > { %v5217_v25 = vpop.permute.xlu0 %3406  ;;  %v5219_v28 = vpop.permute.xlu1 %3401  ;;  %v1891_v21 = vmax.f32 %v5053_v4, %v1871_v43  ;;  %v1890_v38 = vmax.f32 %v5063_v14, %v1870_v18  ;;  %v1892_v59 = vmax.f32 %v5056_v29, %v1872_v47 }
 0x41d   : > { %v3408_v2 = vunpack.i.l.bf16 %v5217_v25  ;;  %v3404_v9 = vunpack.i.h.bf16 %v5219_v28  ;;  %v3403_v37 = vunpack.i.l.bf16 %v5219_v28  ;;  %v3409_v63 = vunpack.i.h.bf16 %v5217_v25 }
 0x41f   : > { %v1925_v19 = vsel %vm910_vm2, %v3404_v9, %v3408_v2  ;;  %v1924_v55 = vsel %vm910_vm2, %v3403_v37, %v3404_v9  ;;  %v1926_v10 = vsel %vm910_vm2, %v3408_v2, %v3409_v63 }
 0x420   : > { %v5226_v48 = vpop.permute.xlu0 %3416  ;;  %v5229_v45 = vpop.permute.xlu1 %3411  ;;  %v1944_v42 = vmax.f32 %v1890_v38, %v1924_v55  ;;  %v1945_v52 = vmax.f32 %v1891_v21, %v1925_v19  ;;  %v1946_v19 = vmax.f32 %v1892_v59, %v1926_v10 }
 0x421   : > { %v3418_v3 = vunpack.i.l.bf16 %v5226_v48  ;;  %v3414_v56 = vunpack.i.h.bf16 %v5229_v45  ;;  %v3413_v34 = vunpack.i.l.bf16 %v5229_v45  ;;  %v3419_v24 = vunpack.i.h.bf16 %v5226_v48 }
 0x423   : > { %v1979_v57 = vsel %vm989_vm3, %v3414_v56, %v3418_v3  ;;  %v1978_v41 = vsel %vm989_vm3, %v3413_v34, %v3414_v56  ;;  %v1980_v25 = vsel %vm989_vm3, %v3418_v3, %v3419_v24 }
 0x424   : > { %v5241_v8 = vpop.permute.xlu0 %3426  ;;  %v5244_v27 = vpop.permute.xlu1 %3421  ;;  %v1998_v58 = vmax.f32 %v1944_v42, %v1978_v41  ;;  %v1999_v14 = vmax.f32 %v1945_v52, %v1979_v57  ;;  %v2000_v2 = vmax.f32 %v1946_v19, %v1980_v25 }
 0x425   : > { %v3428_v15 = vunpack.i.l.bf16 %v5241_v8  ;;  %v3424_v36 = vunpack.i.h.bf16 %v5244_v27  ;;  %v3423_v4 = vunpack.i.l.bf16 %v5244_v27  ;;  %v3429_v17 = vunpack.i.h.bf16 %v5241_v8 }
 0x427   : > { %v2033_v1 = vsel %vm1068_vm4, %v3424_v36, %v3428_v15  ;;  %v2032_v60 = vsel %vm1068_vm4, %v3423_v4, %v3424_v36  ;;  %v2034_v48 = vsel %vm1068_vm4, %v3428_v15, %v3429_v17 }
 0x428   : > { %v3432_v13 = vpop.permute.xlu0 %3431  ;;  %v5252_v39 = vmax.f32 %v1998_v58, %v2032_v60  ;;  %v5254_v6 = vmax.f32 %v1999_v14, %v2033_v1  ;;  %v3447_v61 = vpop.permute.xlu1 %3446  ;;  %v5278_v42 = vmax.f32 %v2000_v2, %v2034_v48 }
 0x429   : > { %v3433_v28 = vunpack.i.l.bf16 %v3432_v13  ;;  %v3449_v9 = vunpack.i.h.bf16 %v3447_v61  ;;  %v3448_v43 = vunpack.i.l.bf16 %v3447_v61  ;;  %v3434_v18 = vunpack.i.h.bf16 %v3432_v13 }
 0x42a   : > { %v5259_v50 = vpack.i.bf16 %v5254_v6, %v5252_v39 }
 0x42b   : > { %v1869_v21 = vsel %vm831_vm1, %v3433_v28, %v3393_v26  ;;  %v1873_v29 = vsel %vm831_vm1, %v3399_v62, %v3448_v43  ;;  %v1874_v3 = vsel %vm831_vm1, %v3434_v18, %v3449_v9 }
 0x42c   : > { %v3437_v20 = vpop.permute.xlu0 %3436  ;;  %v3457_v16 = vpop.permute.xlu1 %3456  ;;  %3556 = vrot.lane.b32.xlu0 %v5259_v50, %s3779_s18  ;;  %v1889_v15 = vmax.f32 %v5138_v22, %v1869_v21  ;;  %v1893_v26 = vmax.f32 %v5059_v49, %v1873_v29  ;;  %v1894_v13 = vmax.f32 %v5141_v12, %v1874_v3 }
 0x42d   : > { %v3438_v55 = vunpack.i.l.bf16 %v3437_v20  ;;  %v3459_v38 = vunpack.i.h.bf16 %v3457_v16  ;;  %v3458_v57 = vunpack.i.l.bf16 %v3457_v16  ;;  %v3439_v62 = vunpack.i.h.bf16 %v3437_v20 }
 0x42f   : > { %v1923_v52 = vsel %vm910_vm2, %v3438_v55, %v3403_v37  ;;  %v1878_v61 = vsel %vm831_vm1, %v3458_v57, %v3459_v38 }
 0x430   : > { %v5266_v46 = vpop.permute.xlu0 %3441  ;;  %v3462_v0 = vpop.permute.xlu1 %3461  ;;  %v5285_v16 = vmax.f32 %v1889_v15, %v1923_v52  ;;  %v1898_v49 = vmax.f32 %v5158_v5, %v1878_v61 }
 0x431   : > { %v3463_v41 = vunpack.i.l.bf16 %v3462_v0  ;;  %v3464_v36 = vunpack.i.h.bf16 %v3462_v0  ;;  %v3443_v55 = vunpack.i.l.bf16 %v5266_v46 }
 0x433   : > { %v1927_v47 = vsel %vm910_vm2, %v3409_v63, %v3463_v41  ;;  %v1928_v0 = vsel %vm910_vm2, %v3439_v62, %v3464_v36  ;;  %v3444_v63 = vunpack.i.h.bf16 %v5266_v46 }
 0x434   : > { %v3452_v31 = vpop.permute.xlu0 %3451  ;;  %v3472_v56 = vpop.permute.xlu1 %3471  ;;  %v1947_v19 = vmax.f32 %v1893_v26, %v1927_v47  ;;  %v5295_v48 = vmax.f32 %v1894_v13, %v1928_v0 }
 0x435   : > { %v3454_v58 = vunpack.i.h.bf16 %v3452_v31  ;;  %v3453_v1 = vunpack.i.l.bf16 %v3452_v31  ;;  %v3474_v10 = vunpack.i.h.bf16 %v3472_v56  ;;  %v3473_v37 = vunpack.i.l.bf16 %v3472_v56 }
 0x437   : > { %v1877_v59 = vsel %vm831_vm1, %v3454_v58, %v3458_v57  ;;  %v1875_v12 = vsel %vm831_vm1, %v3449_v9, %v3453_v1  ;;  %v1876_v43 = vsel %vm831_vm1, %v3453_v1, %v3454_v58  ;;  %v1932_v56 = vsel %vm910_vm2, %v3473_v37, %v3474_v10 }
 0x438   : > { %v3467_v14 = vpop.permute.xlu0 %3466  ;;  %v3477_v60 = vpop.permute.xlu1 %3476  ;;  %v1897_v2 = vmax.f32 %v5174_v54, %v1877_v59  ;;  %v1895_v5 = vmax.f32 %v5135_v40, %v1875_v12  ;;  %v1896_v9 = vmax.f32 %v5171_v33, %v1876_v43 }
 0x439   : > { %v3478_v22 = vunpack.i.l.bf16 %v3477_v60  ;;  %v3468_v28 = vunpack.i.l.bf16 %v3467_v14  ;;  %v3469_v20 = vunpack.i.h.bf16 %v3467_v14  ;;  %v3479_v21 = vunpack.i.h.bf16 %v3477_v60 }
 0x43b   : > { %v1981_v38 = vsel %vm989_vm3, %v3419_v24, %v3478_v22  ;;  %v1929_v57 = vsel %vm910_vm2, %v3464_v36, %v3468_v28  ;;  %v1931_v3 = vsel %vm910_vm2, %v3469_v20, %v3473_v37  ;;  %v1930_v46 = vsel %vm910_vm2, %v3468_v28, %v3469_v20 }
 0x43c   : > { %v3482_v25 = vpop.permute.xlu0 %3481  ;;  %v3487_v18 = vpop.permute.xlu1 %3486  ;;  %v1982_v40 = vsel %vm989_vm3, %v3444_v63, %v3479_v21  ;;  %v2001_v33 = vmax.f32 %v1947_v19, %v1981_v38  ;;  %v1949_v60 = vmax.f32 %v1895_v5, %v1929_v57  ;;  %v1950_v26 = vmax.f32 %v1896_v9, %v1930_v46 }
 0x43d   : > { %v3483_v31 = vunpack.i.l.bf16 %v3482_v25  ;;  %v3488_v41 = vunpack.i.l.bf16 %v3487_v18  ;;  %v3484_v52 = vunpack.i.h.bf16 %v3482_v25  ;;  %v1951_v36 = vmax.f32 %v1897_v2, %v1931_v3 }
 0x43e   : > { %v3489_v13 = vunpack.i.h.bf16 %v3487_v18  ;;  %v1952_v18 = vmax.f32 %v1898_v49, %v1932_v56  ;;  %v2002_v19 = vmax.f32 %v5295_v48, %v1982_v40 }
 0x43f   : > { %v1983_v14 = vsel %vm989_vm3, %v3479_v21, %v3483_v31  ;;  %v1985_v47 = vsel %vm989_vm3, %v3484_v52, %v3488_v41  ;;  %v1984_v10 = vsel %vm989_vm3, %v3483_v31, %v3484_v52 }
 0x440   : > { %v3497_v29 = vpop.permute.xlu0 %3496  ;;  %v3492_v58 = vpop.permute.xlu1 %3491  ;;  %v2003_v37 = vmax.f32 %v1949_v60, %v1983_v14  ;;  %v2004_v63 = vmax.f32 %v1950_v26, %v1984_v10  ;;  %v1986_v2 = vsel %vm989_vm3, %v3488_v41, %v3489_v13  ;;  %v2005_v21 = vmax.f32 %v1951_v36, %v1985_v47 }
 0x441   : > { %v3494_v54 = vunpack.i.h.bf16 %v3492_v58  ;;  %v3493_v15 = vunpack.i.l.bf16 %v3492_v58  ;;  %v3498_v1 = vunpack.i.l.bf16 %v3497_v29  ;;  %v3499_v24 = vunpack.i.h.bf16 %v3497_v29 }
 0x442   : > { %v2006_v3 = vmax.f32 %v1952_v18, %v1986_v2  ;;  %v5684_v2 = vpack.c.bf16 %v4885_v7, %v4863_v35 }
 0x443   : > { %v2035_v61 = vsel %vm1068_vm4, %v3429_v17, %v3493_v15  ;;  %v2037_v22 = vsel %vm1068_vm4, %v3494_v54, %v3498_v1  ;;  %v2038_v43 = vsel %vm1068_vm4, %v3498_v1, %v3499_v24  ;;  %v1977_v17 = vsel %vm989_vm3, %v3443_v55, %v3413_v34 }
 0x444   : > { %v3507_v62 = vpop.permute.xlu0 %3506  ;;  %v5312_v0 = vmax.f32 %v2001_v33, %v2035_v61  ;;  %v3502_v59 = vpop.permute.xlu1 %3501  ;;  %v5323_v5 = vmax.f32 %v2003_v37, %v2037_v22  ;;  %v5327_v38 = vmax.f32 %v2004_v63, %v2038_v43  ;;  %v1997_v29 = vmax.f32 %v5285_v16, %v1977_v17 }
 0x445   : > { %v3504_v28 = vunpack.i.h.bf16 %v3502_v59  ;;  %v3503_v25 = vunpack.i.l.bf16 %v3502_v59  ;;  %v3509_v12 = vunpack.i.h.bf16 %v3507_v62  ;;  %v3508_v20 = vunpack.i.l.bf16 %v3507_v62 }
 0x446   : > { %v3560_v8 = vpack.i.bf16 %v5312_v0, %v5278_v42  ;;  %v3585_v33 = vpack.i.bf16 %v5327_v38, %v5323_v5  ;;  %v5683_v17 = vpack.c.bf16 %v4909_v32, %v4888_v30 }
 0x447   : > { %v2039_v45 = vsel %vm1068_vm4, %v3499_v24, %v3503_v25  ;;  %v2040_v34 = vsel %vm1068_vm4, %v3503_v25, %v3504_v28  ;;  %v2036_v49 = vsel %vm1068_vm4, %v3509_v12, %v3494_v54  ;;  %v2031_v55 = vsel %vm1068_vm4, %v3508_v20, %v3423_v4 }
 0x448   : > { %v3517_v31 = vpop.permute.xlu0 %3516  ;;  %v3512_v9 = vpop.permute.xlu1 %3511  ;;  %3561 = vrot.lane.b32.xlu1 %v3560_v8, %s3779_s18  ;;  %3571 = vrot.lane.b32.xlu0 %v3560_v8, %s3778_s17  ;;  %v5336_v52 = vmax.f32 %v2005_v21, %v2039_v45  ;;  %v5338_v58 = vmax.f32 %v2002_v19, %v2036_v49  ;;  %v5344_v54 = vmax.f32 %v2006_v3, %v2040_v34  ;;  %v2354_v3 = vld [vmem:[%s5603_s5 + $0x8] sm:$0xff] }
 0x449   : > { %v3514_v48 = vunpack.i.h.bf16 %v3512_v9  ;;  %v3519_v56 = vunpack.i.h.bf16 %v3517_v31  ;;  %v3518_v57 = vunpack.i.l.bf16 %v3517_v31  ;;  %v3513_v46 = vunpack.i.l.bf16 %v3512_v9 }
 0x44a   : > { %v5346_v15 = vmax.f32 %v1997_v29, %v2031_v55  ;;  %v3590_v25 = vpack.i.bf16 %v5344_v54, %v5336_v52  ;;  %v5685_v45 = vpack.c.bf16 %v4882_v51, %v4756_v44  ;;  %v5686_v55 = vpack.c.bf16 %v4817_v23, %v4749_v53  ;;  %v2353_v53 = vld [vmem:[%s5603_s5] sm:$0xff]  ;;  %v2355_v23 = vld [vmem:[%s5603_s5 + $0x10] sm:$0xff] }
 0x44b   : > { %v2234_v40 = vsel %vm2231_vm7, %v3514_v48, %v3518_v57  ;;  %v2235_v60 = vsel %vm2231_vm7, %v3518_v57, %v3519_v56  ;;  %v2233_v36 = vsel %vm2231_vm7, %v3513_v46, %v3514_v48 }
 0x44c   : > { %v3527_v41 = vpop.permute.xlu0 %3526  ;;  %v3522_v14 = vpop.permute.xlu1 %3521  ;;  %3566 = vrot.lane.b32.xlu1 %v5259_v50, %s3778_s17  ;;  %3576 = vrot.lane.b32.xlu0 %v5259_v50, %s3780_s19  ;;  %v3595_v12 = vpack.i.bf16 %v5338_v58, %v5346_v15 }
 0x44d   : > { %v3529_v27 = vunpack.i.h.bf16 %v3527_v41  ;;  %v3528_v4 = vunpack.i.l.bf16 %v3527_v41  ;;  %v3524_v16 = vunpack.i.h.bf16 %v3522_v14  ;;  %v3523_v1 = vunpack.i.l.bf16 %v3522_v14 }
 0x44f   : > { %v2239_v24 = vsel %vm2231_vm7, %v3528_v4, %v3529_v27  ;;  %v2238_v26 = vsel %vm2231_vm7, %v3524_v16, %v3528_v4  ;;  %v2237_v13 = vsel %vm2231_vm7, %v3523_v1, %v3524_v16 }
 0x450   : > { %v5354_v50 = vpop.permute.xlu0 %3536  ;;  %v2859_v61 = vpack.c.bf16 %v2239_v24, %v2235_v60  ;;  %v2861_v62 = vpack.c.bf16 %v2238_v26, %v2234_v40  ;;  %v3532_v47 = vpop.permute.xlu1 %3531  ;;  %3581 = vrot.lane.b32.xlu1 %v3560_v8, %s3780_s19  ;;  %3586 = vrot.lane.b32.xlu0 %v3585_v33, %s3779_s18  ;;  %v2843_v10 = vpack.c.bf16 %v2237_v13, %v2233_v36 }
 0x451   : > { %v3534_v37 = vunpack.i.h.bf16 %v3532_v47  ;;  %v3533_v59 = vunpack.i.l.bf16 %v3532_v47  ;;  %v3539_v22 = vunpack.i.h.bf16 %v5354_v50  ;;  %v3538_v28 = vunpack.i.l.bf16 %v5354_v50 }
 0x452   : > { %2860 = vmatprep.subr.bf16.mxu1 %v2859_v61  ;;  %2844 = vmatprep.subr.bf16.mxu0 %v2843_v10  ;;  %v5687_v50 = vmov 0.0  }
 0x453   : > { %2862 = vmatpush1.bf16.msra.mxu1 %v2861_v62  ;;  %v2232_v43 = vsel %vm2231_vm7, %v3533_v59, %v3513_v46  ;;  %v2236_v20 = vsel %vm2231_vm7, %v3534_v37, %v3523_v1  ;;  %v2286_v30 = vsel %vm2284_vm8, %v3538_v28, %v3539_v22  ;;  %v2356_v46 = vld [vmem:[%s5603_s5 + $0x18] sm:$0xff] }
 0x454   : > { %v5368_v8 = vpop.permute.xlu0 %3546  ;;  %2864 = vmatprep.subr.bf16.mxu1 %v5683_v17  ;;  %v2845_v18 = vpack.c.bf16 %v2236_v20, %v2232_v43  ;;  %v3542_v19 = vpop.permute.xlu1 %3541  ;;  %3591 = vrot.lane.b32.xlu1 %v3590_v25, %s3779_s18 }
 0x455   : > { %v3549_v63 = vunpack.i.h.bf16 %v5368_v8  ;;  %v3548_v31 = vunpack.i.l.bf16 %v5368_v8  ;;  %3596 = vrot.lane.b32.xlu0 %v3595_v12, %s3779_s18  ;;  %v3544_v21 = vunpack.i.h.bf16 %v3542_v19  ;;  %v3543_v9 = vunpack.i.l.bf16 %v3542_v19 }
 0x456   : > { %2846 = vmatpush1.bf16.msra.mxu0 %v2845_v18 }
 0x457   : > { %2866 = vmatpush1.bf16.msra.mxu1 %v5684_v2  ;;  %v2290_v32 = vsel %vm2284_vm8, %v3548_v31, %v3549_v63  ;;  %2848 = vmatprep.subr.bf16.mxu0 %v5685_v45  ;;  %v2287_v48 = vsel %vm2284_vm8, %v3539_v22, %v3543_v9  ;;  %v2288_v44 = vsel %vm2284_vm8, %v3543_v9, %v3544_v21 }
 0x458   : > { %v2851_v34 = vpack.c.bf16 %v2290_v32, %v2286_v30  ;;  %v3552_v49 = vpop.permute.xlu1 %3551  ;;  %3601 = vrot.lane.b32.xlu1 %v3585_v33, %s3778_s17 }
 0x459   : > { %3606 = vrot.lane.b32.xlu0 %v3590_v25, %s3778_s17  ;;  %v3554_v35 = vunpack.i.h.bf16 %v3552_v49  ;;  %v3553_v7 = vunpack.i.l.bf16 %v3552_v49 }
 0x45a   : > { %2850 = vmatpush1.bf16.msra.mxu0 %v5686_v55 }
 0x45b   : > { %v2291_v56 = vsel %vm2284_vm8, %v3549_v63, %v3553_v7  ;;  %2852 = vmatprep.subr.bf16.mxu0 %v2851_v34  ;;  %v2292_v51 = vsel %vm2284_vm8, %v3553_v7, %v3554_v35 }
 0x45c   : > { %v2869_v57 = vpack.c.bf16 %v2291_v56, %v2287_v48  ;;  %3611 = vrot.lane.b32.xlu1 %v3595_v12, %s3778_s17  ;;  %v2867_v29 = vpack.c.bf16 %v2292_v51, %v2288_v44 }
 0x45d   : > { %3616 = vrot.lane.b32.xlu0 %v3585_v33, %s3780_s19 }
 0x45e   : > { %2868 = vmatprep.subr.bf16.mxu1 %v2867_v29 }
 0x45f   : > { %2870 = vmatpush1.bf16.msra.mxu1 %v2869_v57 }
 0x460   : > { %3621 = vrot.lane.b32.xlu1 %v3590_v25, %s3780_s19 }
 0x461   : > { %3626 = vrot.lane.b32.xlu0 %v3595_v12, %s3780_s19  ;;  %s5559_s19 = scalar_lea.vmem %s5604_s6, %s2810_s16 }
 0x464   : > { %3631 = vrot.lane.b32.xlu1 %v5155_v11, %s3782_s23 }
 0x465   : > { %2359 = vperm.xlu0 %2894, %v2353_v53  }
 0x468   : > { %2364 = vperm.xlu1 %3635, %v2354_v3  }
 0x469   : > { %2369 = vperm.xlu0 %2894, %v2355_v23  }
 0x46c   : > { %2374 = vperm.xlu1 %3635, %v2356_v46  }
 0x49e   : > { %v3557_v41 = vpop.permute.xlu0 %3556 }
 0x49f   : > { %v3559_v16 = vunpack.i.h.bf16 %v3557_v41  ;;  %v3558_v1 = vunpack.i.l.bf16 %v3557_v41 }
 0x4a1   : > { %v2092_v13 = vsel %vm1157_vm5, %v3558_v1, %v3559_v16 }
 0x4a2   : > { %v2108_v22 = vmax.f32 %v5252_v39, %v2092_v13 }
 0x4ba   : > { %v3562_v14 = vpop.permute.xlu1 %3561  ;;  %v3572_v27 = vpop.permute.xlu0 %3571 }
 0x4bb   : > { %v3564_v40 = vunpack.i.h.bf16 %v3562_v14  ;;  %v3563_v33 = vunpack.i.l.bf16 %v3562_v14  ;;  %v3574_v61 = vunpack.i.h.bf16 %v3572_v27  ;;  %v3573_v62 = vunpack.i.l.bf16 %v3572_v27 }
 0x4bd   : > { %v2094_v47 = vsel %vm1157_vm5, %v3563_v33, %v3564_v40  ;;  %v2093_v25 = vsel %vm1157_vm5, %v3559_v16, %v3563_v33  ;;  %v2138_v21 = vsel %vm1226_vm6, %v3573_v62, %v3574_v61 }
 0x4be   : > { %v5416_v11 = vpop.permute.xlu1 %3566  ;;  %v5418_v4 = vpop.permute.xlu0 %3576  ;;  %v2110_v19 = vmax.f32 %v5278_v42, %v2094_v47  ;;  %v2109_v32 = vmax.f32 %v5254_v6, %v2093_v25 }
 0x4bf   : > { %v3569_v60 = vunpack.i.h.bf16 %v5416_v11  ;;  %v3568_v24 = vunpack.i.l.bf16 %v5416_v11  ;;  %v3579_v37 = vunpack.i.h.bf16 %v5418_v4  ;;  %v3578_v59 = vunpack.i.l.bf16 %v5418_v4 }
 0x4c0   : > { %v2154_v29 = vmax.f32 %v2110_v19, %v2138_v21 }
 0x4c1   : > { %v2136_v10 = vsel %vm1226_vm6, %v3568_v24, %v3569_v60  ;;  %v2137_v63 = vsel %vm1226_vm6, %v3569_v60, %v3573_v62  ;;  %v5438_v9 = vsel %vm298_vm0, %v3578_v59, %v3579_v37 }
 0x4c2   : > { %v3582_v26 = vpop.permute.xlu1 %3581  ;;  %v3587_v36 = vpop.permute.xlu0 %3586  ;;  %v5431_v2 = vmax.f32 %v2108_v22, %v2136_v10  ;;  %v2153_v56 = vmax.f32 %v2109_v32, %v2137_v63 }
 0x4c3   : > { %v3583_v12 = vunpack.i.l.bf16 %v3582_v26  ;;  %v3589_v17 = vunpack.i.h.bf16 %v3587_v36  ;;  %v3588_v18 = vunpack.i.l.bf16 %v3587_v36  ;;  %v3584_v30 = vunpack.i.h.bf16 %v3582_v26 }
 0x4c4   : > { %v2196_v53 = vmax.f32 %v5431_v2, %v5438_v9 }
 0x4c5   : > { %v5441_v34 = vsel %vm298_vm0, %v3579_v37, %v3583_v12  ;;  %v2096_v44 = vsel %vm1157_vm5, %v3588_v18, %v3589_v17  ;;  %v2182_v23 = vsel %vm298_vm0, %v3583_v12, %v3584_v30 }
 0x4c6   : > { %v3592_v43 = vpop.permute.xlu1 %3591  ;;  %v2197_v46 = vmax.f32 %v2153_v56, %v5441_v34  ;;  %v2112_v11 = vmax.f32 %v5323_v5, %v2096_v44  ;;  %v2198_v47 = vmax.f32 %v2154_v29, %v2182_v23 }
 0x4c7   : > { %v3597_v20 = vpop.permute.xlu0 %3596  ;;  %v3593_v45 = vunpack.i.l.bf16 %v3592_v43  ;;  %v3594_v49 = vunpack.i.h.bf16 %v3592_v43 }
 0x4c8   : > { %v3599_v35 = vunpack.i.h.bf16 %v3597_v20  ;;  %v3598_v7 = vunpack.i.l.bf16 %v3597_v20 }
 0x4c9   : > { %v2097_v41 = vsel %vm1157_vm5, %v3589_v17, %v3593_v45  ;;  %v2098_v16 = vsel %vm1157_vm5, %v3593_v45, %v3594_v49 }
 0x4ca   : > { %v3602_v55 = vpop.permute.xlu1 %3601  ;;  %v2095_v40 = vsel %vm1157_vm5, %v3599_v35, %v3588_v18  ;;  %v2091_v33 = vsel %vm1157_vm5, %v3598_v7, %v3558_v1  ;;  %v2113_v10 = vmax.f32 %v5327_v38, %v2097_v41  ;;  %v2114_v20 = vmax.f32 %v5336_v52, %v2098_v16 }
 0x4cb   : > { %v3607_v48 = vpop.permute.xlu0 %3606  ;;  %v3604_v51 = vunpack.i.h.bf16 %v3602_v55  ;;  %v3603_v57 = vunpack.i.l.bf16 %v3602_v55  ;;  %v2111_v17 = vmax.f32 %v5338_v58, %v2095_v40  ;;  %v2107_v18 = vmax.f32 %v5346_v15, %v2091_v33 }
 0x4cc   : > { %v3608_v3 = vunpack.i.l.bf16 %v3607_v48  ;;  %v3609_v27 = vunpack.i.h.bf16 %v3607_v48 }
 0x4cd   : > { %v2140_v14 = vsel %vm1226_vm6, %v3603_v57, %v3604_v51 }
 0x4ce   : > { %v3612_v60 = vpop.permute.xlu1 %3611  ;;  %v2156_v37 = vmax.f32 %v2112_v11, %v2140_v14  ;;  %v2141_v22 = vsel %vm1226_vm6, %v3604_v51, %v3608_v3  ;;  %v2142_v25 = vsel %vm1226_vm6, %v3608_v3, %v3609_v27  ;;  %v2205_v3 = vmax.f32 %v2197_v46, %v5278_v42 }
 0x4cf   : > { %v3617_v26 = vpop.permute.xlu0 %3616  ;;  %v3614_v36 = vunpack.i.h.bf16 %v3612_v60  ;;  %v3613_v13 = vunpack.i.l.bf16 %v3612_v60  ;;  %v2157_v45 = vmax.f32 %v2113_v10, %v2141_v22  ;;  %v2158_v34 = vmax.f32 %v2114_v20, %v2142_v25 }
 0x4d0   : > { %v3619_v61 = vunpack.i.h.bf16 %v3617_v26  ;;  %v3618_v62 = vunpack.i.l.bf16 %v3617_v26  ;;  %v2206_v14 = vmax.f32 %v2198_v47, %v5312_v0 }
 0x4d1   : > { %v2139_v12 = vsel %vm1226_vm6, %v3614_v36, %v3603_v57  ;;  %v2135_v43 = vsel %vm1226_vm6, %v3613_v13, %v3568_v24 }
 0x4d2   : > { %v2184_v1 = vsel %vm298_vm0, %v3618_v62, %v3619_v61  ;;  %v3622_v63 = vpop.permute.xlu1 %3621  ;;  %v2151_v49 = vmax.f32 %v2107_v18, %v2135_v43  ;;  %v2155_v35 = vmax.f32 %v2111_v17, %v2139_v12 }
 0x4d3   : > { %v2200_v19 = vmax.f32 %v2156_v37, %v2184_v1  ;;  %v3627_v2 = vpop.permute.xlu0 %3626  ;;  %v3624_v30 = vunpack.i.h.bf16 %v3622_v63  ;;  %v3623_v32 = vunpack.i.l.bf16 %v3622_v63 }
 0x4d4   : > { %v3629_v21 = vunpack.i.h.bf16 %v3627_v2  ;;  %v3628_v9 = vunpack.i.l.bf16 %v3627_v2 }
 0x4d5   : > { %v2185_v24 = vsel %vm298_vm0, %v3619_v61, %v3623_v32  ;;  %v2186_v7 = vsel %vm298_vm0, %v3623_v32, %v3624_v30  ;;  %v2208_v23 = vmax.f32 %v2200_v19, %v5327_v38  ;;  %v2204_v38 = vmax.f32 %v2196_v53, %v5254_v6  ;;  %v2318_v6 = vld [vmem:[%s5602_s4 + $0x8] sm:$0xff] }
 0x4d6   : > { %v2179_v58 = vsel %vm298_vm0, %v3628_v9, %v3578_v59  ;;  %v2183_v15 = vsel %vm298_vm0, %v3629_v21, %v3618_v62  ;;  %v2201_v55 = vmax.f32 %v2157_v45, %v2185_v24  ;;  %v2202_v48 = vmax.f32 %v2158_v34, %v2186_v7  ;;  %v3632_v51 = vpop.permute.xlu1 %3631 }
 0x4d7   : > { %v2195_v56 = vmax.f32 %v2151_v49, %v2179_v58  ;;  %v2199_v44 = vmax.f32 %v2155_v35, %v2183_v15  ;;  %v3634_v57 = vunpack.i.h.bf16 %v3632_v51  ;;  %v3633_v29 = vunpack.i.l.bf16 %v3632_v51 }
 0x4d8   : > { %v2209_v41 = vmax.f32 %v2201_v55, %v5336_v52  ;;  %v2210_v4 = vmax.f32 %v2202_v48, %v5344_v54  ;;  %v2855_v0 = vpack.c.bf16 %v2208_v23, %v2204_v38 }
 0x4d9   : > { %v2203_v59 = vmax.f32 %v2195_v56, %v5252_v39  ;;  %v2289_v27 = vsel %vm2284_vm8, %v3634_v57, %v3548_v31  ;;  %v2285_v11 = vsel %vm2284_vm8, %v3633_v29, %v3538_v28  ;;  %v2207_v42 = vmax.f32 %v2199_v44, %v5323_v5  ;;  %v2317_v39 = vld [vmem:[%s5602_s4] sm:$0xff]  ;;  %v2319_v5 = vld [vmem:[%s5602_s4 + $0x10] sm:$0xff]  ;;  %v2320_v28 = vld [vmem:[%s5602_s4 + $0x18] sm:$0xff] }
 0x4da   : > { %v2853_v46 = vpack.c.bf16 %v2289_v27, %v2285_v11  ;;  %v2871_v52 = vpack.c.bf16 %v2210_v4, %v2206_v14  ;;  %v2873_v16 = vpack.c.bf16 %v2209_v41, %v2205_v3 }
 0x4db   : > { %v2857_v54 = vpack.c.bf16 %v2207_v42, %v2203_v59 }
 0x4dc   : > { %2854 = vmatpush1.bf16.msra.mxu0 %v2853_v46  ;;  %2872 = vmatprep.subr.bf16.mxu1 %v2871_v52 }
 0x4dd   : > { %2856 = vmatprep.subr.bf16.mxu0 %v2855_v0  ;;  %2874 = vmatpush1.bf16.msra.mxu1 %v2873_v16 }
 0x4e0   : > { %2858 = vmatpush1.bf16.msra.mxu0 %v2857_v54  ;;  %2787 = vmatmul.mubr.msk.f32.vlgmr.msra.gmra.mrb[8].mxu1 %vm1226_vm6, %v2317_v39 }
 0x4e1   : > { %2548 = vmatprep.mubr.f32.mxu1 %v5687_v50 }
 0x4e3   : > { %2783 = vmatmul.mubr.msk.f32.vlgmr.msra.gmra.mrb[8].mxu0 %vm1226_vm6, %v2317_v39 }
 0x4e4   : > { %2788 = vmatmul.mubr.msk.f32.gmra.mrb[10].mxu1 %vm1226_vm6, %v2318_v6  ;;  %2459 = vmatprep.mubr.f32.mxu0 %v5687_v50  ;;  %v2360_v8 = vpop.permute.xlu0 %2359 }
 0x4e5   : > { %2554 = vmatprep.mubr.f32.mxu1 %v5687_v50 }
 0x4e7   : > { %2784 = vmatmul.mubr.msk.f32.gmra.mrb[10].mxu0 %vm1226_vm6, %v2318_v6  ;;  %v2365_v60 = vpop.permute.xlu1 %2364 }
 0x4e8   : > { %2789 = vmatmul.mubr.msk.f32.gmra.mrb[12].mxu1 %vm1226_vm6, %v2319_v5  ;;  %2465 = vmatprep.mubr.f32.mxu0 %v5687_v50  ;;  %v2370_v43 = vpop.permute.xlu0 %2369 }
 0x4e9   : > { %2560 = vmatprep.mubr.f32.mxu1 %v5687_v50 }
 0x4eb   : > { %2785 = vmatmul.mubr.msk.f32.gmra.mrb[12].mxu0 %vm1226_vm6, %v2319_v5  ;;  %v2375_v34 = vpop.permute.xlu1 %2374 }
 0x4ec   : > { %2790 = vmatmul.mubr.msk.f32.gmra.mrb[14].mxu1 %vm1226_vm6, %v2320_v28  ;;  %2471 = vmatprep.mubr.f32.mxu0 %v5687_v50 }
 0x4ef   : > { %2786 = vmatmul.mubr.msk.f32.gmra.mrb[14].mxu0 %vm1226_vm6, %v2320_v28 }
 0x5b3   : > { %v2544_v31 = vpop.f32.mrb[8].mxu1 }
 0x5b4   : > { %v5509_v53 = vadd.f32 %v2544_v31, %v2360_v8  ;;  %v2546_v40 = vpop.f32.mrb[9].mxu1 }
 0x5b5   : > { %v5511_v33 = vadd.f32 %v2546_v40, %v2360_v8 }
 0x5b6   : > { %v2793_v26 = vmul.f32 -1.442695, %v5509_v53  ;;  %v2455_v36 = vpop.f32.mrb[8].mxu0 }
 0x5b7   : > { %v2794_v13 = vmul.f32 -1.442695, %v5511_v33  ;;  %v5515_v61 = vadd.f32 %v2455_v36, %v2360_v8  ;;  %v2457_v62 = vpop.f32.mrb[9].mxu0  ;;  %v2550_v47 = vpop.f32.mrb[10].mxu1 }
 0x5b8   : > { %3700 = vpow2.f32 %v2793_v26  ;;  %v5517_v10 = vadd.f32 %v2457_v62, %v2360_v8  ;;  %v5519_v37 = vadd.f32 %v2550_v47, %v2365_v60  ;;  %v2552_v22 = vpop.f32.mrb[11].mxu1 }
 0x5b9   : > { %3702 = vpow2.f32 %v2794_v13  ;;  %v2791_v25 = vmul.f32 -1.442695, %v5515_v61  ;;  %v5522_v12 = vadd.f32 %v2552_v22, %v2365_v60 }
 0x5ba   : > { %v2792_v1 = vmul.f32 -1.442695, %v5517_v10  ;;  %v2797_v20 = vmul.f32 -1.442695, %v5519_v37  ;;  %v2461_v17 = vpop.f32.mrb[10].mxu0 }
 0x5bb   : > { %3704 = vpow2.f32 %v2791_v25  ;;  %v2798_v18 = vmul.f32 -1.442695, %v5522_v12  ;;  %v5527_v19 = vadd.f32 %v2461_v17, %v2365_v60  ;;  %v2463_v63 = vpop.f32.mrb[11].mxu0  ;;  %v2556_v2 = vpop.f32.mrb[12].mxu1 }
 0x5bc   : > { %3706 = vpow2.f32 %v2792_v1  ;;  %v5529_v30 = vadd.f32 %v2463_v63, %v2365_v60  ;;  %v5531_v32 = vadd.f32 %v2556_v2, %v2370_v43  ;;  %v2558_v21 = vpop.f32.mrb[13].mxu1 }
 0x5bd   : > { %3708 = vpow2.f32 %v2797_v20  ;;  %v2795_v9 = vmul.f32 -1.442695, %v5527_v19  ;;  %v5534_v45 = vadd.f32 %v2558_v21, %v2370_v43 }
 0x5be   : > { %3710 = vpow2.f32 %v2798_v18  ;;  %v2796_v49 = vmul.f32 -1.442695, %v5529_v30  ;;  %v2801_v35 = vmul.f32 -1.442695, %v5531_v32  ;;  %v2467_v24 = vpop.f32.mrb[12].mxu0 }
 0x5bf   : > { %3712 = vpow2.f32 %v2795_v9  ;;  %v2802_v7 = vmul.f32 -1.442695, %v5534_v45  ;;  %v5539_v58 = vadd.f32 %v2467_v24, %v2370_v43  ;;  %v2469_v15 = vpop.f32.mrb[13].mxu0  ;;  %v2562_v55 = vpop.f32.mrb[14].mxu1 }
 0x5c0   : > { %3714 = vpow2.f32 %v2796_v49  ;;  %v5541_v48 = vadd.f32 %v2469_v15, %v2370_v43  ;;  %v5543_v56 = vadd.f32 %v2562_v55, %v2375_v34  ;;  %v2564_v44 = vpop.f32.mrb[15].mxu1 }
 0x5c1   : > { %3716 = vpow2.f32 %v2801_v35  ;;  %v2799_v51 = vmul.f32 -1.442695, %v5539_v58  ;;  %v5548_v6 = vadd.f32 %v2564_v44, %v2375_v34 }
 0x5c2   : > { %v3701_v57 = vpop.eup %3700  ;;  %3718 = vpow2.f32 %v2802_v7  ;;  %v2800_v29 = vmul.f32 -1.442695, %v5541_v48  ;;  %v2473_v23 = vpop.f32.mrb[14].mxu0  ;;  %v2805_v14 = vmul.f32 -1.442695, %v5543_v56 }
 0x5c3   : > { %v3703_v3 = vpop.eup %3702  ;;  %v2617_v41 = vadd.f32 1.0, %v3701_v57  ;;  %3720 = vpow2.f32 %v2799_v51  ;;  %v2475_v4 = vpop.f32.mrb[15].mxu0  ;;  %v5550_v8 = vadd.f32 %v2473_v23, %v2375_v34  ;;  %v2806_v47 = vmul.f32 -1.442695, %v5548_v6 }
 0x5c4   : > { %v2618_v59 = vadd.f32 1.0, %v3703_v3  ;;  %3722 = vpow2.f32 %v2800_v29  ;;  %v5553_v36 = vadd.f32 %v2475_v4, %v2375_v34 }
 0x5c5   : > { %v3705_v27 = vpop.eup %3704  ;;  %3724 = vrcp.f32 %v2617_v41  ;;  %v2803_v43 = vmul.f32 -1.442695, %v5550_v8 }
 0x5c6   : > { %v3707_v11 = vpop.eup %3706  ;;  %3726 = vrcp.f32 %v2618_v59  ;;  %v2615_v38 = vadd.f32 1.0, %v3705_v27  ;;  %v2804_v63 = vmul.f32 -1.442695, %v5553_v36 }
 0x5c7   : > { %v3709_v42 = vpop.eup %3708  ;;  %v2616_v46 = vadd.f32 1.0, %v3707_v11  ;;  %3728 = vpow2.f32 %v2805_v14 }
 0x5c8   : > { %v3711_v52 = vpop.eup %3710  ;;  %3730 = vrcp.f32 %v2615_v38  ;;  %v2621_v16 = vadd.f32 1.0, %v3709_v42 }
 0x5c9   : > { %v3713_v0 = vpop.eup %3712  ;;  %3732 = vrcp.f32 %v2616_v46  ;;  %v2622_v39 = vadd.f32 1.0, %v3711_v52 }
 0x5ca   : > { %v3715_v54 = vpop.eup %3714  ;;  %3734 = vrcp.f32 %v2621_v16  ;;  %v2619_v50 = vadd.f32 1.0, %v3713_v0 }
 0x5cb   : > { %v3717_v5 = vpop.eup %3716  ;;  %3736 = vrcp.f32 %v2622_v39  ;;  %v2620_v28 = vadd.f32 1.0, %v3715_v54 }
 0x5cc   : > { %v3719_v31 = vpop.eup %3718  ;;  %3738 = vrcp.f32 %v2619_v50  ;;  %v2625_v40 = vadd.f32 1.0, %v3717_v5 }
 0x5cd   : > { %v3721_v60 = vpop.eup %3720  ;;  %3740 = vrcp.f32 %v2620_v28  ;;  %v2626_v26 = vadd.f32 1.0, %v3719_v31 }
 0x5ce   : > { %v3723_v13 = vpop.eup %3722  ;;  %3742 = vrcp.f32 %v2625_v40  ;;  %v2623_v62 = vadd.f32 1.0, %v3721_v60 }
 0x5cf   : > { %v3725_v22 = vpop.eup %3724  ;;  %3744 = vrcp.f32 %v2626_v26  ;;  %v2624_v25 = vadd.f32 1.0, %v3723_v13 }
 0x5d0   : > { %v3727_v1 = vpop.eup %3726  ;;  %v2665_v20 = vmul.f32 %v3725_v22, %v5509_v53  ;;  %3746 = vrcp.f32 %v2623_v62 }
 0x5d1   : > { %v3729_v17 = vpop.eup %3728  ;;  %v2666_v18 = vmul.f32 %v3727_v1, %v5511_v33  ;;  %3748 = vrcp.f32 %v2624_v25 }
 0x5d2   : > { %v3731_v2 = vpop.eup %3730  ;;  %2681 = vst [vmem:[%s5559_s19 + $0x10] sm:$0xff] %v2665_v20  ;;  %v2629_v21 = vadd.f32 1.0, %v3729_v17  ;;  %3750 = vpow2.f32 %v2806_v47 }
 0x5d3   : > { %v3733_v9 = vpop.eup %3732  ;;  %2682 = vst [vmem:[%s5559_s19 + $0x18] sm:$0xff] %v2666_v18  ;;  %v2663_v34 = vmul.f32 %v3731_v2, %v5515_v61  ;;  %3752 = vpow2.f32 %v2803_v43 }
 0x5d4   : > { %v3735_v53 = vpop.eup %3734  ;;  %v2664_v49 = vmul.f32 %v3733_v9, %v5517_v10  ;;  %3754 = vrcp.f32 %v2629_v21 }
 0x5d5   : > { %v3737_v33 = vpop.eup %3736  ;;  %2679 = vst [vmem:[%s5559_s19] sm:$0xff] %v2663_v34  ;;  %v2669_v35 = vmul.f32 %v3735_v53, %v5519_v37  ;;  %3756 = vpow2.f32 %v2804_v63 }
 0x5d6   : > { %v3739_v24 = vpop.eup %3738  ;;  %2680 = vst [vmem:[%s5559_s19 + $0x8] sm:$0xff] %v2664_v49  ;;  %v2670_v7 = vmul.f32 %v3737_v33, %v5522_v12 }
 0x5d7   : > { %v3741_v15 = vpop.eup %3740  ;;  %2685 = vst [vmem:[%s5559_s19 + $0x30] sm:$0xff] %v2669_v35  ;;  %v2667_v61 = vmul.f32 %v3739_v24, %v5527_v19 }
 0x5d8   : > { %v3743_v55 = vpop.eup %3742  ;;  %2686 = vst [vmem:[%s5559_s19 + $0x38] sm:$0xff] %v2670_v7  ;;  %v2668_v10 = vmul.f32 %v3741_v15, %v5529_v30 }
 0x5d9   : > { %v3745_v44 = vpop.eup %3744  ;;  %2683 = vst [vmem:[%s5559_s19 + $0x20] sm:$0xff] %v2667_v61  ;;  %v2673_v37 = vmul.f32 %v3743_v55, %v5531_v32 }
 0x5da   : > { %v3747_v51 = vpop.eup %3746  ;;  %2684 = vst [vmem:[%s5559_s19 + $0x28] sm:$0xff] %v2668_v10  ;;  %v2674_v57 = vmul.f32 %v3745_v44, %v5534_v45 }
 0x5db   : > { %v3749_v12 = vpop.eup %3748  ;;  %2689 = vst [vmem:[%s5559_s19 + $0x50] sm:$0xff] %v2673_v37  ;;  %v2671_v29 = vmul.f32 %v3747_v51, %v5539_v58 }
 0x5dc   : > { %v3751_v19 = vpop.eup %3750  ;;  %2690 = vst [vmem:[%s5559_s19 + $0x58] sm:$0xff] %v2674_v57  ;;  %v2672_v23 = vmul.f32 %v3749_v12, %v5541_v48 }
 0x5dd   : > { %v3753_v3 = vpop.eup %3752  ;;  %2687 = vst [vmem:[%s5559_s19 + $0x40] sm:$0xff] %v2671_v29  ;;  %v2630_v30 = vadd.f32 1.0, %v3751_v19 }
 0x5de   : > { %v3755_v41 = vpop.eup %3754  ;;  %2688 = vst [vmem:[%s5559_s19 + $0x48] sm:$0xff] %v2672_v23  ;;  %v2627_v32 = vadd.f32 1.0, %v3753_v3 }
 0x5df   : > { %v3757_v14 = vpop.eup %3756  ;;  %v2677_v45 = vmul.f32 %v3755_v41, %v5543_v56  ;;  %3758 = vrcp.f32 %v2630_v30 }
 0x5e0   : > { %3760 = vrcp.f32 %v2627_v32  ;;  %v2628_v4 = vadd.f32 1.0, %v3757_v14 }
 0x5e1   : > { %2693 = vst [vmem:[%s5559_s19 + $0x70] sm:$0xff] %v2677_v45 }
 0x5e2   : > { %3762 = vrcp.f32 %v2628_v4 }
 0x5e9   : > { %v3759_v58 = vpop.eup %3758 }
 0x5ea   : > { %v3761_v59 = vpop.eup %3760  ;;  %v2678_v48 = vmul.f32 %v3759_v58, %v5548_v6 }
 0x5eb   : > { %v2675_v27 = vmul.f32 %v3761_v59, %v5550_v8 }
 0x5ec   : > { %v3763_v11 = vpop.eup %3762  ;;  %2694 = vst [vmem:[%s5559_s19 + $0x78] sm:$0xff] %v2678_v48 }
 0x5ed   : > { %2691 = vst [vmem:[%s5559_s19 + $0x60] sm:$0xff] %v2675_v27  ;;  %v2676_v38 = vmul.f32 %v3763_v11, %v5553_v36 }
 0x5ef   : > { %2692 = vst [vmem:[%s5559_s19 + $0x68] sm:$0xff] %v2676_v38 }
 0x5f0 PF: > { %s16_s21 = sadd.s32 1, %s3770_s21  }
 0x5f1   : > { %p13_p4 = scmp.ge.s32.totalorder %s16_s21, 4  }
 0x5f3   :  { %15 = sbr.rel (!%p13_p4) target bundleno = 1 (0x1), region = 74 }

</bundles_post_ra>
